<compile_context>
chip_gen: v7x
topology: tpu7x:2x2x1
jax: 0.10.0
libtpu: 0.0.40
codegen_flags: <defaults>
</compile_context>

<pallas_src>
import functools

import jax
import jax.numpy as jnp
from jax.experimental import pallas as pl
from jax.experimental.pallas import tpu as pltpu


def _round_up(x, m):
    return ((x + m - 1) // m) * m


# ----------------------------------------------------------------------------
# Fused Pallas kernel
# ----------------------------------------------------------------------------
def _captioner_fused_kernel(x_ref, ew_ref, eb_ref, wf_ref, cb_ref,
                            emb_ref, dwe_ref, dwc_ref, db_ref,
                            o_ref, *, B, T):
    cdt = wf_ref.dtype  # bf16 MXU operand dtype; accumulation/epilogues are f32

    # ---- image_encoder (synthetic stand-in): flatten -> Linear -> ReLU ----
    feat = jnp.dot(x_ref[...], ew_ref[...], preferred_element_type=jnp.float32)
    feat = jnp.maximum(feat + eb_ref[...], 0.0)                       # (B, Fp) f32

    # ---- folded projection + context merge (exact algebra) ----
    # PyTorch:  proj   = feat @ proj_w + proj_b                       (B, 4096)
    #           hidden = proj[:, :2048].reshape(2, B, 1024)
    #           cell   = proj[:, 2048:].reshape(2, B, 1024)
    #           context = tanh(hidden[0] + hidden[1] + cell[0] + cell[1])
    # With flat = (feat @ W_fold).reshape(2B, 1024) (row-major):
    #           context[b] = tanh(flat[b] + flat[B+b] + ctx_bias[b])
    # W_fold / ctx_bias are pre-folded in f32 in prepare_params / the wrapper.
    if B % 2 == 0:
        # Even B: the paired rows share the same 1024-column window, so the row
        # pairing folds into the matmul M dim too (half-M, N=2048 projection).
        half = B // 2
        fsum = feat[:half] + feat[half:]                              # (B//2, Fp) f32
        s = jnp.dot(fsum.astype(cdt), wf_ref[...],
                    preferred_element_type=jnp.float32)               # (B//2, 2048) f32
        # ctx rows 0,2,4,... come from s[:, :1024]; rows 1,3,5,... from s[:, 1024:].
        ctx_pre = jnp.stack([s[:, :1024], s[:, 1024:]], axis=1).reshape(B, 1024)
    else:
        # Odd B fallback: paired rows use opposite column windows; build the B
        # context rows with static slices, still ONE batched ctx matmul below.
        proj = jnp.dot(feat.astype(cdt), wf_ref[...],
                       preferred_element_type=jnp.float32)            # (B, 2048) f32
        left, right = proj[:, :1024], proj[:, 1024:]
        rows = []
        for b in range(B):                                            # B is trace-time static
            m0, m1 = b, B + b
            p0 = (left if m0 % 2 == 0 else right)[m0 // 2:m0 // 2 + 1, :]
            p1 = (left if m1 % 2 == 0 else right)[m1 // 2:m1 // 2 + 1, :]
            rows.append(p0 + p1)
        ctx_pre = jnp.concatenate(rows, axis=0)                       # (B, 1024) f32

    ctx = jnp.tanh(ctx_pre + cb_ref[...])                             # (B, 1024) f32

    # ---- text_decoder (synthetic stand-in), split-weight & fully batched ----
    # logits = concat(emb, ctx) @ W + b == emb @ W[:E] + ctx @ W[E:] + b
    emb_logits = jnp.dot(emb_ref[...], dwe_ref[...],
                         preferred_element_type=jnp.float32)          # (B*T, Vp) f32
    ctx_logits = jnp.dot(ctx.astype(cdt), dwc_ref[...],
                         preferred_element_type=jnp.float32) + db_ref[...]   # (B, Vp) f32

    vp = emb_logits.shape[-1]
    out = emb_logits.reshape(B, T, vp) + ctx_logits[:, None, :]       # (B, T, Vp) f32
    o_ref[...] = out.reshape(B * T, vp).astype(o_ref.dtype)           # one lane-dense store


# ----------------------------------------------------------------------------
# Parameters (f32 master) and one-time prep (cast / pad / fold, off the step path)
# ----------------------------------------------------------------------------
def init_params(key, *, in_channels, height, width,
                num_image_features, vocab_size, embed_dim):
    flat = in_channels * height * width
    ks = jax.random.split(key, 6)
    scale = 0.02
    return {
        # synthetic image_encoder: Linear(flat -> num_image_features)
        "enc_w": scale * jax.random.normal(ks[0], (flat, num_image_features), jnp.float32),
        "enc_b": jnp.zeros((num_image_features,), jnp.float32),
        # the module's own projection: Linear(num_image_features -> 4096)
        "proj_w": scale * jax.random.normal(ks[1], (num_image_features, 4096), jnp.float32),
        "proj_b": scale * jax.random.normal(ks[2], (4096,), jnp.float32),
        # synthetic text_decoder
        "embed": scale * jax.random.normal(ks[3], (vocab_size, embed_dim), jnp.float32),
        "dec_w": scale * jax.random.normal(ks[4], (embed_dim + 1024, vocab_size), jnp.float32),
        "dec_b": scale * jax.random.normal(ks[5], (vocab_size,), jnp.float32),
    }


def prepare_params(params):
    """One-time weight prep: fold (in f32), zero-pad to 128-lane shapes, cast to bf16."""
    K, F = params["enc_w"].shape
    E = params["embed"].shape[1]
    V = params["dec_b"].shape[0]
    Kp, Fp, Ep, Vp = _round_up(K, 128), _round_up(F, 128), _round_up(E, 128), _round_up(V, 128)
    cdt = jnp.bfloat16

    enc_w = jnp.pad(params["enc_w"], ((0, Kp - K), (0, Fp - F)))
    enc_b = jnp.pad(params["enc_b"], (0, Fp - F)).reshape(1, Fp)

    # Exact fold of the hidden+cell column pairing (f32 before the bf16 cast).
    w_fold = params["proj_w"][:, :2048] + params["proj_w"][:, 2048:]      # (F, 2048)
    w_fold = jnp.pad(w_fold, ((0, Fp - F), (0, 0)))
    b_fold2 = (params["proj_b"][:2048] + params["proj_b"][2048:]).reshape(2, 1024)

    embed = jnp.pad(params["embed"], ((0, 0), (0, Ep - E)))

    dec_w = params["dec_w"]
    dec_w_e = jnp.pad(dec_w[:E], ((0, Ep - E), (0, Vp - V)))              # (Ep, Vp)
    dec_w_c = jnp.pad(dec_w[E:], ((0, 0), (0, Vp - V)))                   # (1024, Vp)
    dec_b = jnp.pad(params["dec_b"], (0, Vp - V)).reshape(1, Vp)

    return {
        "enc_w": enc_w.astype(cdt),
        "enc_b": enc_b.astype(jnp.float32),
        "w_fold": w_fold.astype(cdt),
        "b_fold2": b_fold2.astype(jnp.float32),
        "embed": embed.astype(cdt),
        "dec_w_e": dec_w_e.astype(cdt),
        "dec_w_c": dec_w_c.astype(cdt),
        "dec_b": dec_b.astype(jnp.float32),
    }


# ----------------------------------------------------------------------------
# Forward (jitted per-step path) and plain-JAX reference
# ----------------------------------------------------------------------------
def basic_image_captioner_forward(prep, image, captions, *, vocab_size):
    B = image.shape[0]
    T = captions.shape[1]
    Kp, _ = prep["enc_w"].shape
    Ep = prep["embed"].shape[1]
    Vp = prep["dec_b"].shape[1]
    cdt = prep["enc_w"].dtype

    # plain-JAX prep of the *activations* only (weights were prepped once).
    x = image.reshape(B, -1)
    if x.shape[1] != Kp:
        x = jnp.pad(x, ((0, 0), (0, Kp - x.shape[1])))
    x = x.astype(cdt)

    # caption-embedding gather stays in plain JAX (no clean in-kernel gather).
    emb2d = jnp.take(prep["embed"], captions, axis=0).reshape(B * T, Ep)

    # Per-row context bias (tiny, B x 1024 f32):
    #   ctx_bias[b] = b_fold[(b % 2) window] + b_fold[((B + b) % 2) window]
    idx0 = jnp.asarray([b % 2 for b in range(B)], jnp.int32)
    idx1 = jnp.asarray([(B + b) % 2 for b in range(B)], jnp.int32)
    ctx_bias = prep["b_fold2"][idx0] + prep["b_fold2"][idx1]              # (B, 1024) f32

    kernel = functools.partial(_captioner_fused_kernel, B=B, T=T)
    logits_p = pl.pallas_call(
        kernel,
        out_shape=jax.ShapeDtypeStruct((B * T, Vp), jnp.float32),
        compiler_params=pltpu.CompilerParams(vmem_limit_bytes=32 * 1024 * 1024),
    )(x, prep["enc_w"], prep["enc_b"], prep["w_fold"], ctx_bias,
      emb2d, prep["dec_w_e"], prep["dec_w_c"], prep["dec_b"])

    # drop the zero pad columns and restore (B, T, V)
    return logits_p[:, :vocab_size].reshape(B, T, vocab_size)


def reference_forward(params, image, captions):
    """f32 reference with the original (unfused, unfolded) PyTorch semantics."""
    B = image.shape[0]
    T = captions.shape[1]
    E = params["embed"].shape[1]
    feat = jnp.maximum(image.reshape(B, -1) @ params["enc_w"] + params["enc_b"], 0.0)
    proj = feat @ params["proj_w"] + params["proj_b"]
    hidden = proj[:, :2048].reshape(2, B, 1024)
    cell = proj[:, 2048:].reshape(2, B, 1024)
    context = jnp.tanh(hidden[0] + hidden[1] + cell[0] + cell[1])          # (B, 1024)
    emb = params["embed"][captions]                                        # (B, T, E)
    ctx_b = jnp.broadcast_to(context[:, None, :], (B, T, 1024))
    cat = jnp.concatenate([emb, ctx_b], axis=-1).reshape(B * T, E + 1024)
    logits = cat @ params["dec_w"] + params["dec_b"]
    return logits.reshape(B, T, -1)


# ----------------------------------------------------------------------------
# Driver
# ----------------------------------------------------------------------------
if __name__ == "__main__":
    B, C, H, W = 2, 4, 16, 16
    T = 8                      # caption length
    NUM_IMAGE_FEATURES = 64
    VOCAB = 32
    EMBED = 32

    key = jax.random.PRNGKey(0)
    k_img, k_cap, k_param = jax.random.split(key, 3)

    image = jax.random.normal(k_img, (B, C, H, W), jnp.float32)
    captions = jax.random.randint(k_cap, (B, T), 0, VOCAB, jnp.int32)

    params = init_params(
        k_param, in_channels=C, height=H, width=W,
        num_image_features=NUM_IMAGE_FEATURES, vocab_size=VOCAB, embed_dim=EMBED)

    prep = prepare_params(params)   # one-time cast/pad/fold, hoisted off the step path
    fwd = jax.jit(functools.partial(basic_image_captioner_forward, vocab_size=VOCAB))

    preds = fwd(prep, image, captions)
    jax.block_until_ready(preds)

    assert preds.shape == (B, T, VOCAB), preds.shape
    assert preds.dtype == jnp.float32

    # Tolerance-based check vs the f32 reference (kernel uses bf16 matmul operands).
    ref = reference_forward(params, image, captions)
    max_err = float(jnp.max(jnp.abs(preds - ref)))
    assert max_err < 5e-2, f"max abs err vs reference: {max_err}"

    print("KERNEL_OK")
</pallas_src>

<mosaic_0001>
module attributes {stable_mosaic.version = 11 : i64} {
  func.func @_captioner_fused_kernel(%arg0: memref<2x1024xbf16, #tpu.memory_space<vmem>>, %arg1: memref<1024x128xbf16, #tpu.memory_space<vmem>>, %arg2: memref<1x128xf32, #tpu.memory_space<vmem>>, %arg3: memref<128x2048xbf16, #tpu.memory_space<vmem>>, %arg4: memref<2x1024xf32, #tpu.memory_space<vmem>>, %arg5: memref<16x128xbf16, #tpu.memory_space<vmem>>, %arg6: memref<128x128xbf16, #tpu.memory_space<vmem>>, %arg7: memref<1024x128xbf16, #tpu.memory_space<vmem>>, %arg8: memref<1x128xf32, #tpu.memory_space<vmem>>, %arg9: memref<16x128xf32, #tpu.memory_space<vmem>>) attributes {dimension_semantics = [], scalar_prefetch = 0 : i64, scratch_operands = 0 : i64, tpu.core_type = #tpu.core_type<tc>} {
    %c0 = arith.constant 0 : index
    %c0_0 = arith.constant 0 : index
    %0 = vector.load %arg0[%c0, %c0_0] : memref<2x1024xbf16, #tpu.memory_space<vmem>>, vector<2x1024xbf16>
    %c0_1 = arith.constant 0 : index
    %c0_2 = arith.constant 0 : index
    %1 = vector.load %arg1[%c0_1, %c0_2] : memref<1024x128xbf16, #tpu.memory_space<vmem>>, vector<1024x128xbf16>
    %cst = arith.constant dense<0.000000e+00> : vector<2x128xf32>
    %2 = tpu.matmul %0, %1, %cst {dimension_numbers = #tpu.dot_dimension_numbers<[1], [0], [0], [1], [0, 0, 1, 1], [], []>} : vector<2x1024xbf16>, vector<1024x128xbf16>, vector<2x128xf32> -> vector<2x128xf32>
    %c0_3 = arith.constant 0 : index
    %c0_4 = arith.constant 0 : index
    %3 = vector.load %arg2[%c0_3, %c0_4] : memref<1x128xf32, #tpu.memory_space<vmem>>, vector<1x128xf32>
    %4 = vector.broadcast %3 : vector<1x128xf32> to vector<2x128xf32>
    %5 = arith.addf %2, %4 : vector<2x128xf32>
    %cst_5 = arith.constant 0.000000e+00 : f32
    %6 = vector.broadcast %cst_5 : f32 to vector<2x128xf32>
    %7 = arith.maximumf %5, %6 : vector<2x128xf32>
    %8 = vector.extract_strided_slice %7 {offsets = [0, 0], sizes = [1, 128], strides = [1, 1]} : vector<2x128xf32> to vector<1x128xf32>
    %9 = vector.extract_strided_slice %7 {offsets = [1, 0], sizes = [1, 128], strides = [1, 1]} : vector<2x128xf32> to vector<1x128xf32>
    %10 = arith.addf %8, %9 : vector<1x128xf32>
    %11 = arith.truncf %10 : vector<1x128xf32> to vector<1x128xbf16>
    %c0_6 = arith.constant 0 : index
    %c0_7 = arith.constant 0 : index
    %12 = vector.load %arg3[%c0_6, %c0_7] : memref<128x2048xbf16, #tpu.memory_space<vmem>>, vector<128x2048xbf16>
    %cst_8 = arith.constant dense<0.000000e+00> : vector<1x2048xf32>
    %13 = tpu.matmul %11, %12, %cst_8 {dimension_numbers = #tpu.dot_dimension_numbers<[1], [0], [0], [1], [0, 0, 1, 1], [], []>} : vector<1x128xbf16>, vector<128x2048xbf16>, vector<1x2048xf32> -> vector<1x2048xf32>
    %14 = vector.extract_strided_slice %13 {offsets = [0, 0], sizes = [1, 1024], strides = [1, 1]} : vector<1x2048xf32> to vector<1x1024xf32>
    %15 = vector.extract_strided_slice %13 {offsets = [0, 1024], sizes = [1, 1024], strides = [1, 1]} : vector<1x2048xf32> to vector<1x1024xf32>
    %16 = vector.shape_cast %14 : vector<1x1024xf32> to vector<1x1x1024xf32>
    %17 = vector.shape_cast %15 : vector<1x1024xf32> to vector<1x1x1024xf32>
    %18 = tpu.concatenate %16, %17 in 1 : vector<1x1x1024xf32>, vector<1x1x1024xf32> -> vector<1x2x1024xf32>
    %19 = vector.shape_cast %18 : vector<1x2x1024xf32> to vector<2x1024xf32>
    %c0_9 = arith.constant 0 : index
    %c0_10 = arith.constant 0 : index
    %20 = vector.load %arg4[%c0_9, %c0_10] : memref<2x1024xf32, #tpu.memory_space<vmem>>, vector<2x1024xf32>
    %21 = arith.addf %19, %20 : vector<2x1024xf32>
    %22 = math.tanh %21 : vector<2x1024xf32>
    %c0_11 = arith.constant 0 : index
    %c0_12 = arith.constant 0 : index
    %23 = vector.load %arg5[%c0_11, %c0_12] : memref<16x128xbf16, #tpu.memory_space<vmem>>, vector<16x128xbf16>
    %c0_13 = arith.constant 0 : index
    %c0_14 = arith.constant 0 : index
    %24 = vector.load %arg6[%c0_13, %c0_14] : memref<128x128xbf16, #tpu.memory_space<vmem>>, vector<128x128xbf16>
    %cst_15 = arith.constant dense<0.000000e+00> : vector<16x128xf32>
    %25 = tpu.matmul %23, %24, %cst_15 {dimension_numbers = #tpu.dot_dimension_numbers<[1], [0], [0], [1], [0, 0, 1, 1], [], []>} : vector<16x128xbf16>, vector<128x128xbf16>, vector<16x128xf32> -> vector<16x128xf32>
    %26 = arith.truncf %22 : vector<2x1024xf32> to vector<2x1024xbf16>
    %c0_16 = arith.constant 0 : index
    %c0_17 = arith.constant 0 : index
    %27 = vector.load %arg7[%c0_16, %c0_17] : memref<1024x128xbf16, #tpu.memory_space<vmem>>, vector<1024x128xbf16>
    %cst_18 = arith.constant dense<0.000000e+00> : vector<2x128xf32>
    %28 = tpu.matmul %26, %27, %cst_18 {dimension_numbers = #tpu.dot_dimension_numbers<[1], [0], [0], [1], [0, 0, 1, 1], [], []>} : vector<2x1024xbf16>, vector<1024x128xbf16>, vector<2x128xf32> -> vector<2x128xf32>
    %c0_19 = arith.constant 0 : index
    %c0_20 = arith.constant 0 : index
    %29 = vector.load %arg8[%c0_19, %c0_20] : memref<1x128xf32, #tpu.memory_space<vmem>>, vector<1x128xf32>
    %30 = vector.broadcast %29 : vector<1x128xf32> to vector<2x128xf32>
    %31 = arith.addf %28, %30 : vector<2x128xf32>
    %32 = vector.shape_cast %25 : vector<16x128xf32> to vector<2x8x128xf32>
    %33 = vector.shape_cast %31 : vector<2x128xf32> to vector<2x1x128xf32>
    %34 = vector.broadcast %33 : vector<2x1x128xf32> to vector<2x8x128xf32>
    %35 = arith.addf %32, %34 : vector<2x8x128xf32>
    %36 = vector.shape_cast %35 : vector<2x8x128xf32> to vector<16x128xf32>
    %c0_21 = arith.constant 0 : index
    %c0_22 = arith.constant 0 : index
    %37 = vector.load %arg9[%c0_21, %c0_22] : memref<16x128xf32, #tpu.memory_space<vmem>>, vector<16x128xf32>
    tpu.vector_store %arg9[%c0_21, %c0_22], %36 {strides = array<i32>} : memref<16x128xf32, #tpu.memory_space<vmem>>, vector<16x128xf32>,
    return
  }
}

</mosaic_0001>

<bundles_post_ra>
// kernel: basic_image_captioner_forward.1
= control target key start
LH: loop header
LB: loop body
LE: loop exit
PB: predicated region body
PF: predicated region fallthrough
CT: control target
= control target key end

     0   :  { %14 = vsyncpa [#allocation3], 0  ;;  %s3961_s0 = inlined_call_operand.vmem [shape: bf16[2,1024], index: 0, kind: input, shape index: {}]   ;;  %s3962_s1 = inlined_call_operand.vmem [shape: bf16[1024,128], index: 1, kind: input, shape index: {}]   ;;  %s3963_s2 = inlined_call_operand.hbm [shape: f32[1,128], index: 2, kind: input, shape index: {}]   ;;  %s3964_s3 = inlined_call_operand.hbm [shape: bf16[128,2048], index: 3, kind: input, shape index: {}]   ;;  %s3965_s4 = inlined_call_operand.vmem [shape: f32[2,1024], index: 4, kind: input, shape index: {}]   ;;  %s3966_s5 = inlined_call_operand.vmem [shape: bf16[16,128], index: 5, kind: input, shape index: {}]   ;;  %s3967_s6 = inlined_call_operand.vmem [shape: bf16[128,128], index: 6, kind: input, shape index: {}]   ;;  %s3968_s7 = inlined_call_operand.hbm [shape: bf16[1024,128], index: 7, kind: input, shape index: {}]   ;;  %s3969_s8 = inlined_call_operand.vmem [shape: f32[1,128], index: 8, kind: input, shape index: {}]   ;;  %s3970_s9 = inlined_call_operand.vmem [shape: f32[16,128], index: 9, kind: output, shape index: {}]  }
   0x1   :  { %15 = vsyncpa [#allocation5], 0  ;;  %s3559_s30 = smov [#allocation4]   ;;  %s3489_s13 = scalar_lea.hbm %s3964_s3, 16384 }
   0x2   :  { %s35_s10 = sshll.u32 %s3559_s30, 4  ;;  %p3490_p0 = scmp.ne.s32.totalorder %s3964_s3, %s3489_s13  ;;  %s36_s10 = int_to_ptr.vmem [resolvable:$true] %s35_s10 }
   0x3   :  { %p3493_p1 = scmp.lt.u32.totalorder %s3489_s13, %s3964_s3 }
   0x5   :  { %p3495_p2 = pnand %p3493_p1, %p3490_p0 }
   0x7   :  { %3498 = shalt.err (!%p3495_p2)
}
   0x8   :  { %s3499_s18 = scalar_lea.vmem %s36_s10, 16384  ;;  %p3504_p4 = scmp.lt.s32.totalorder %s36_s10, %s36_s10 }
   0x9   :  { %p3500_p3 = scmp.ne.s32.totalorder %s36_s10, %s3499_s18  ;;  %p3505_p5 = scmp.lt.s32.totalorder %s3499_s18, %s3499_s18 }
   0xb   :  { %p3506_p6 = por %p3505_p5, %p3504_p4 }
   0xd   :  { %p3507_p7 = pnand %p3506_p6, %p3500_p3 }
   0xf   :  { %3510 = shalt.err (!%p3507_p7)
}
  0x10   :  { %s3560_s19 = smov 1024   ;;  %s3561_s20 = smov 64  }
  0x11   :  { %41 = dma.hbm_to_vmem [thread:$0]  %s3964_s3, 16384, %s36_s10, [#allocation5], %s3560_s19, %s3560_s19, %s3561_s20  }
  0x12   :  { %s3562_s23 = smov [#allocation2]   ;;  %s3563_s25 = smov [#allocation6]  }
  0x13   :  { %s26_s24 = sshll.u32 %s3562_s23, 4  ;;  %s53_s26 = sshll.u32 %s3563_s25, 4  ;;  %s27_s24 = int_to_ptr.vmem [resolvable:$true] %s26_s24  ;;  %s54_s26 = int_to_ptr.vmem [resolvable:$true] %s53_s26 }
  0x14   :  { %s3511_s29 = scalar_lea.hbm %s3963_s2, 16 }
  0x15   :  { %p3512_p8 = scmp.ne.s32.totalorder %s3963_s2, %s3511_s29  ;;  %p3515_p9 = scmp.lt.u32.totalorder %s3511_s29, %s3963_s2 }
  0x17   :  { %p3517_p10 = pnand %p3515_p9, %p3512_p8 }
  0x19   :  { %3520 = shalt.err (!%p3517_p10)
}
  0x1a   :  { %s3521_s3 = scalar_lea.vmem %s27_s24, 16  ;;  %s3525_s10 = scalar_lea.vmem %s27_s24, 32 }
  0x1b   :  { %p3522_p11 = scmp.ne.s32.totalorder %s27_s24, %s3521_s3  ;;  %p3526_p12 = scmp.lt.s32.totalorder %s27_s24, %s27_s24 }
  0x1c   :  { %p3527_p13 = scmp.lt.s32.totalorder %s3525_s10, %s3521_s3 }
  0x1e   :  { %p3528_p0 = por %p3527_p13, %p3526_p12 }
  0x20   :  { %p3529_p1 = pnand %p3528_p0, %p3522_p11 }
  0x22   :  { %3532 = shalt.err (!%p3529_p1)
}
  0x23   :  { %29 = dma.hbm_to_vmem [thread:$0]  %s3963_s2, 16, %s27_s24, [#allocation3]  }
  0x24   :  { %s3533_s18 = scalar_lea.hbm %s3968_s7, 8192 }
  0x25   :  { %p3534_p2 = scmp.ne.s32.totalorder %s3968_s7, %s3533_s18  ;;  %p3537_p3 = scmp.lt.u32.totalorder %s3533_s18, %s3968_s7 }
  0x27   :  { %p3539_p4 = pnand %p3537_p3, %p3534_p2 }
  0x29   :  { %3542 = shalt.err (!%p3539_p4)
}
  0x2a   :  { %s3543_s25 = scalar_lea.vmem %s54_s26, 8192  ;;  %p3548_p6 = scmp.lt.s32.totalorder %s54_s26, %s54_s26 }
  0x2b   :  { %p3544_p5 = scmp.ne.s32.totalorder %s54_s26, %s3543_s25  ;;  %p3549_p7 = scmp.lt.s32.totalorder %s3543_s25, %s3543_s25 }
  0x2d   :  { %p3550_p8 = por %p3549_p7, %p3548_p6 }
  0x2f   :  { %p3551_p9 = pnand %p3550_p8, %p3544_p5 }
  0x31   :  { %3554 = shalt.err (!%p3551_p9)
}
  0x32   :  { %s3564_s2 = smov 4  }
  0x33   :  { %59 = dma.hbm_to_vmem [thread:$0]  %s3968_s7, 8192, %s54_s26, [#allocation5], %s3561_s20, %s3561_s20, %s3564_s2  }
  0x34   :  { %3555 = dma.done.wait [#allocation3], 16  }
  0x35   :  { %3556 = vsyncadd [#allocation3], 4294967280 }
  0x36   :  { %3557 = dma.done.wait [#allocation5], 24576  }
  0x37   :  { %3558 = vsyncadd [#allocation5], 4294942720  ;;  %v3333_v0 = vld [vmem:[%s3962_s1 + $0x40] sm:$0xff]   ;;  %v3337_v4 = vld [vmem:[%s3962_s1 + $0x48] sm:$0xff]   ;;  %v3565_v22 = vmov 1966171168   ;;  %v213_v24 = vlaneseq }
  0x38   :  { %v3334_v1 = vld [vmem:[%s3962_s1 + $0xc0] sm:$0xff]   ;;  %3117 = vmatprep.subr.bf16.mxu0 %v3333_v0  ;;  %v3338_v5 = vld [vmem:[%s3962_s1 + $0xc8] sm:$0xff]   ;;  %v3341_v8 = vld [vmem:[%s3962_s1 + $0x50] sm:$0xff]   ;;  %v211_v23 = vunpack.c.l.s4 %v3565_v22  ;;  %vm3568_vm0 = vmmov 0   ;;  %vm1936_vm1 = vcmask 1040384  }
  0x39   :  { %v3335_v2 = vld [vmem:[%s3962_s1] sm:$0xff]   ;;  %3139 = vmatprep.subr.bf16.mxu1 %v3334_v1  ;;  %v3339_v6 = vld [vmem:[%s3962_s1 + $0x8] sm:$0xff]   ;;  %v3342_v9 = vld [vmem:[%s3962_s1 + $0xd0] sm:$0xff]   ;;  %v3737_v30 = vshrl.u32 %v213_v24, 7 }
  0x3a   :  { %v3336_v3 = vld [vmem:[%s3962_s1 + $0x80] sm:$0xff]   ;;  %3118 = vmatpush3.bf16.msra.mxu0 %v3335_v2  ;;  %v3340_v7 = vld [vmem:[%s3962_s1 + $0x88] sm:$0xff]   ;;  %v3343_v10 = vld [vmem:[%s3962_s1 + $0x10] sm:$0xff]   ;;  %v212_v29 = vunpack.c.0.s8 %v211_v23 }
  0x3b   :  { %3140 = vmatpush3.bf16.msra.mxu1 %v3336_v3  ;;  %3119 = vmatprep.subr.bf16.mxu0 %v3337_v4  ;;  %v3344_v11 = vld [vmem:[%s3962_s1 + $0x90] sm:$0xff]   ;;  %v3345_v12 = vld [vmem:[%s3962_s1 + $0x58] sm:$0xff]   ;;  %v3349_v16 = vld [vmem:[%s3962_s1 + $0x60] sm:$0xff]  }
  0x3c   :  { %3141 = vmatprep.subr.bf16.mxu1 %v3338_v5  ;;  %v3346_v13 = vld [vmem:[%s3962_s1 + $0xd8] sm:$0xff]   ;;  %v3350_v17 = vld [vmem:[%s3962_s1 + $0xe0] sm:$0xff]   ;;  %v3353_v20 = vld [vmem:[%s3962_s1 + $0x68] sm:$0xff]   ;;  %v3752_v35 = vsub.s32 %v212_v29, %v3737_v30 }
  0x3d   :  { %v3347_v14 = vld [vmem:[%s3962_s1 + $0x18] sm:$0xff]   ;;  %v3351_v18 = vld [vmem:[%s3962_s1 + $0x20] sm:$0xff]   ;;  %v3354_v21 = vld [vmem:[%s3962_s1 + $0xe8] sm:$0xff]  }
  0x3e   :  { %3120 = vmatpush3.bf16.msra.mxu0 %v3339_v6  ;;  %v3348_v15 = vld [vmem:[%s3962_s1 + $0x98] sm:$0xff]   ;;  %v3352_v19 = vld [vmem:[%s3962_s1 + $0xa0] sm:$0xff]   ;;  %v3355_v25 = vld [vmem:[%s3962_s1 + $0x28] sm:$0xff]  }
  0x3f   :  { %3142 = vmatpush3.bf16.msra.mxu1 %v3340_v7  ;;  %3121 = vmatprep.subr.bf16.mxu0 %v3341_v8  ;;  %v3356_v26 = vld [vmem:[%s3962_s1 + $0xa8] sm:$0xff]   ;;  %v3357_v27 = vld [vmem:[%s3962_s1 + $0x70] sm:$0xff]   ;;  %v3361_v33 = vld [vmem:[%s3962_s1 + $0x78] sm:$0xff]  }
  0x40   :  { %3143 = vmatprep.subr.bf16.mxu1 %v3342_v9  ;;  %v3358_v28 = vld [vmem:[%s3962_s1 + $0xf0] sm:$0xff]   ;;  %v3362_v34 = vld [vmem:[%s3962_s1 + $0xf8] sm:$0xff]   ;;  %v72_v38 = vld [vmem:[%s3961_s0] sm:$0xff] }
  0x41   :  { %v3359_v31 = vld [vmem:[%s3962_s1 + $0x30] sm:$0xff]   ;;  %v3363_v36 = vld [vmem:[%s3962_s1 + $0x38] sm:$0xff]   ;;  %v209_v39 = vcombine.high %v72_v38, %v72_v38  ;;  %v216_v40 = vrot.slane %v72_v38, %v3752_v35  ;;  %v3366_v41 = vld [vmem:[%s3962_s1 + $0x140] sm:$0xff]  }
  0x42   :  { %3122 = vmatpush3.bf16.msra.mxu0 %v3343_v10  ;;  %v3360_v32 = vld [vmem:[%s3962_s1 + $0xb0] sm:$0xff]   ;;  %v3364_v37 = vld [vmem:[%s3962_s1 + $0xb8] sm:$0xff]   ;;  %v3367_v42 = vld [vmem:[%s3962_s1 + $0x1c0] sm:$0xff]  }
  0x43   :  { %3144 = vmatpush3.bf16.msra.mxu1 %v3344_v11  ;;  %3123 = vmatprep.subr.bf16.mxu0 %v3345_v12  ;;  %v224_v43 = vcombine.high %v216_v40, %v216_v40  ;;  %v232_v44 = vrot.slane %v216_v40, %v3752_v35  ;;  %v3772_v45 = vrot.slane %v209_v39, %v3752_v35  ;;  %v3368_v46 = vld [vmem:[%s3962_s1 + $0x100] sm:$0xff]   ;;  %v3370_v51 = vld [vmem:[%s3962_s1 + $0x148] sm:$0xff]   ;;  %v3374_v58 = vld [vmem:[%s3962_s1 + $0x150] sm:$0xff]  }
  0x44   :  { %3145 = vmatprep.subr.bf16.mxu1 %v3346_v13  ;;  %v3369_v48 = vld [vmem:[%s3962_s1 + $0x180] sm:$0xff]   ;;  %v3371_v53 = vld [vmem:[%s3962_s1 + $0x1c8] sm:$0xff]   ;;  %v3375_v59 = vld [vmem:[%s3962_s1 + $0x1d0] sm:$0xff]  }
  0x45   :  { %v246_v47 = vrot.slane %v224_v43, %v3752_v35  ;;  %v225_v49 = vcombine.high %v3772_v45, %v3772_v45  ;;  %v254_v50 = vcombine.high %v232_v44, %v232_v44  ;;  %v3372_v55 = vld [vmem:[%s3962_s1 + $0x108] sm:$0xff]   ;;  %v3376_v60 = vld [vmem:[%s3962_s1 + $0x110] sm:$0xff]   ;;  %v3378_v62 = vld [vmem:[%s3962_s1 + $0x158] sm:$0xff]  }
  0x46   :  { %3124 = vmatpush3.bf16.msra.mxu0 %v3347_v14  ;;  %v3373_v56 = vld [vmem:[%s3962_s1 + $0x188] sm:$0xff]   ;;  %v3377_v61 = vld [vmem:[%s3962_s1 + $0x190] sm:$0xff]   ;;  %v3379_v63 = vld [vmem:[%s3962_s1 + $0x1d8] sm:$0xff]  }
  0x47   :  { %3146 = vmatpush3.bf16.msra.mxu1 %v3348_v15  ;;  %3125 = vmatprep.subr.bf16.mxu0 %v3349_v16  ;;  %v256_v52 = vcombine.high %v246_v47, %v246_v47  ;;  %v253_v54 = vrot.slane %v225_v49, %v3752_v35  ;;  %v3380_v0 = vld [vmem:[%s3962_s1 + $0x118] sm:$0xff]   ;;  %v3382_v2 = vld [vmem:[%s3962_s1 + $0x160] sm:$0xff]   ;;  %v3386_v6 = vld [vmem:[%s3962_s1 + $0x168] sm:$0xff]  }
  0x48   :  { %3147 = vmatprep.subr.bf16.mxu1 %v3350_v17  ;;  %682 = vmatprep.mubr.bf16.mxu0 %v246_v47  ;;  %v3381_v1 = vld [vmem:[%s3962_s1 + $0x198] sm:$0xff]   ;;  %v3383_v3 = vld [vmem:[%s3962_s1 + $0x1e0] sm:$0xff]   ;;  %v3387_v7 = vld [vmem:[%s3962_s1 + $0x1e8] sm:$0xff]  }
  0x49   :  { %722 = vmatprep.mubr.bf16.mxu1 %v256_v52  ;;  %v257_v57 = vcombine.high %v253_v54, %v253_v54  ;;  %v3384_v4 = vld [vmem:[%s3962_s1 + $0x120] sm:$0xff]   ;;  %v3388_v8 = vld [vmem:[%s3962_s1 + $0x128] sm:$0xff]   ;;  %v3390_v10 = vld [vmem:[%s3962_s1 + $0x170] sm:$0xff]  }
  0x4a   :  { %3126 = vmatpush3.bf16.msra.mxu0 %v3351_v18  ;;  %v3385_v5 = vld [vmem:[%s3962_s1 + $0x1a0] sm:$0xff]   ;;  %v3389_v9 = vld [vmem:[%s3962_s1 + $0x1a8] sm:$0xff]   ;;  %v3391_v11 = vld [vmem:[%s3962_s1 + $0x1f0] sm:$0xff]   ;;  %v239_v18 = vrot.slane %v3772_v45, %v3752_v35 }
  0x4b   :  { %3148 = vmatpush3.bf16.msra.mxu1 %v3352_v19  ;;  %3127 = vmatprep.subr.bf16.mxu0 %v3353_v20  ;;  %v3392_v12 = vld [vmem:[%s3962_s1 + $0x130] sm:$0xff]   ;;  %v3394_v14 = vld [vmem:[%s3962_s1 + $0x178] sm:$0xff]   ;;  %v816_v20 = vld [vmem:[#allocation4] sm:$0xff] }
  0x4c   :  { %3149 = vmatprep.subr.bf16.mxu1 %v3354_v21  ;;  %v3393_v13 = vld [vmem:[%s3962_s1 + $0x1b0] sm:$0xff]   ;;  %v3395_v15 = vld [vmem:[%s3962_s1 + $0x1f8] sm:$0xff]   ;;  %v255_v19 = vcombine.high %v239_v18, %v239_v18  ;;  %v824_v21 = vld [vmem:[#allocation4 + $0x40] sm:$0xff] }
  0x4d   :  { %v3396_v16 = vld [vmem:[%s3962_s1 + $0x138] sm:$0xff]   ;;  %v817_v22 = vld [vmem:[#allocation4 + $0x8] sm:$0xff]  ;;  %v2915_v23 = vcombine.low %v816_v20, %v824_v21  ;;  %v2916_v24 = vcombine.high %v816_v20, %v824_v21  ;;  %v872_v45 = vld [vmem:[#allocation4 + $0x1c0] sm:$0xff] }
  0x4e   :  { %3128 = vmatpush3.bf16.msra.mxu0 %v3355_v25  ;;  %v3397_v17 = vld [vmem:[%s3962_s1 + $0x1b8] sm:$0xff]   ;;  %v825_v25 = vld [vmem:[#allocation4 + $0x48] sm:$0xff]  ;;  %v880_v52 = vld [vmem:[#allocation4 + $0x200] sm:$0xff] }
  0x4f   :  { %3150 = vmatpush3.bf16.msra.mxu1 %v3356_v26  ;;  %3129 = vmatprep.subr.bf16.mxu0 %v3357_v27  ;;  %v832_v26 = vld [vmem:[#allocation4 + $0x80] sm:$0xff]  ;;  %v2918_v29 = vcombine.high %v817_v22, %v825_v25  ;;  %v849_v38 = vld [vmem:[#allocation4 + $0x108] sm:$0xff] }
  0x50   :  { %3151 = vmatprep.subr.bf16.mxu1 %v3358_v28  ;;  %v840_v27 = vld [vmem:[#allocation4 + $0xc0] sm:$0xff]  ;;  %v2917_v28 = vcombine.low %v817_v22, %v825_v25  ;;  %v857_v39 = vld [vmem:[#allocation4 + $0x148] sm:$0xff]  ;;  %v818_v22 = vld [vmem:[#allocation4 + $0x10] sm:$0xff]  ;;  %v3566_v25 = vmov 0  }
  0x51   :  { %v2931_v40 = vcombine.low %v832_v26, %v840_v27  ;;  %v2950_v43 = vcombine.high %v849_v38, %v857_v39  ;;  %v873_v47 = vld [vmem:[#allocation4 + $0x1c8] sm:$0xff]  ;;  %v2949_v49 = vcombine.low %v849_v38, %v857_v39 }
  0x52   :  { %3130 = vmatpush3.bf16.msra.mxu0 %v3359_v31  ;;  %v2932_v31 = vcombine.high %v832_v26, %v840_v27 }
  0x53   :  { %3152 = vmatpush3.bf16.msra.mxu1 %v3360_v32  ;;  %3131 = vmatprep.subr.bf16.mxu0 %v3361_v33  ;;  %v833_v32 = vld [vmem:[#allocation4 + $0x88] sm:$0xff] }
  0x54   :  { %3153 = vmatprep.subr.bf16.mxu1 %v3362_v34  ;;  %v841_v33 = vld [vmem:[#allocation4 + $0xc8] sm:$0xff]  ;;  %v848_v34 = vld [vmem:[#allocation4 + $0x100] sm:$0xff] }
  0x56   :  { %3132 = vmatpush3.bf16.msra.mxu0 %v3363_v36  ;;  %v2934_v36 = vcombine.high %v833_v32, %v841_v33 }
  0x57   :  { %3154 = vmatpush3.bf16.msra.mxu1 %v3364_v37  ;;  %3161 = vmatprep.subr.bf16.mxu0 %v3366_v41  ;;  %v856_v37 = vld [vmem:[#allocation4 + $0x140] sm:$0xff]  ;;  %v2933_v41 = vcombine.low %v833_v32, %v841_v33  ;;  %v2850_v33 = vld [vmem:[#allocation2] ss:$0 sm:$0xff] }
  0x58   :  { %3183 = vmatprep.subr.bf16.mxu1 %v3367_v42  ;;  %v2948_v42 = vcombine.high %v848_v34, %v856_v37 }
  0x59   :  { %683 = vmatmul.mubr.bf16.vlgmr.msra.gmra.mrb[0].mxu0 %v232_v44  ;;  %v864_v44 = vld [vmem:[#allocation4 + $0x180] sm:$0xff] }
  0x5a   :  { %3162 = vmatpush3.bf16.msra.mxu0 %v3368_v46  ;;  %723 = vmatmul.mubr.bf16.vlgmr.msra.gmra.mrb[0].mxu1 %v254_v50  ;;  %v865_v46 = vld [vmem:[#allocation4 + $0x188] sm:$0xff]  ;;  %v2964_v50 = vcombine.high %v864_v44, %v872_v45 }
  0x5b   :  { %3163 = vmatprep.subr.bf16.mxu0 %v3370_v51  ;;  %3184 = vmatpush3.bf16.msra.mxu1 %v3369_v48  ;;  %v2947_v48 = vcombine.low %v848_v34, %v856_v37  ;;  %v2966_v51 = vcombine.high %v865_v46, %v873_v47 }
  0x5c   :  { %762 = vmatprep.mubr.bf16.mxu0 %v253_v54  ;;  %3185 = vmatprep.subr.bf16.mxu1 %v3371_v53  ;;  %v888_v53 = vld [vmem:[#allocation4 + $0x240] sm:$0xff]  ;;  %v881_v54 = vld [vmem:[#allocation4 + $0x208] sm:$0xff] }
  0x5d   :  { %802 = vmatprep.mubr.bf16.mxu1 %v257_v57  ;;  %v2965_v57 = vcombine.low %v865_v46, %v873_v47 }
  0x5e   :  { %3164 = vmatpush3.bf16.msra.mxu0 %v3372_v55  ;;  %v889_v55 = vld [vmem:[#allocation4 + $0x248] sm:$0xff] }
  0x5f   :  { %3165 = vmatprep.subr.bf16.mxu0 %v3374_v58  ;;  %3186 = vmatpush3.bf16.msra.mxu1 %v3373_v56  ;;  %v2963_v56 = vcombine.low %v864_v44, %v872_v45  ;;  %v2980_v58 = vcombine.high %v880_v52, %v888_v53 }
  0x60   :  { %3187 = vmatprep.subr.bf16.mxu1 %v3375_v59  ;;  %v2982_v59 = vcombine.high %v881_v54, %v889_v55 }
  0x62   :  { %3166 = vmatpush3.bf16.msra.mxu0 %v3376_v60  ;;  %v2979_v60 = vcombine.low %v880_v52, %v888_v53 }
  0x63   :  { %3167 = vmatprep.subr.bf16.mxu0 %v3378_v62  ;;  %3188 = vmatpush3.bf16.msra.mxu1 %v3377_v61  ;;  %v2981_v61 = vcombine.low %v881_v54, %v889_v55  ;;  %v896_v62 = vld [vmem:[#allocation4 + $0x280] sm:$0xff] }
  0x64   :  { %3189 = vmatprep.subr.bf16.mxu1 %v3379_v63  ;;  %v904_v63 = vld [vmem:[#allocation4 + $0x2c0] sm:$0xff] }
  0x66   :  { %3168 = vmatpush3.bf16.msra.mxu0 %v3380_v0  ;;  %v897_v0 = vld [vmem:[#allocation4 + $0x288] sm:$0xff] }
  0x67   :  { %3169 = vmatprep.subr.bf16.mxu0 %v3382_v2  ;;  %3190 = vmatpush3.bf16.msra.mxu1 %v3381_v1  ;;  %v2996_v1 = vcombine.high %v896_v62, %v904_v63  ;;  %v905_v2 = vld [vmem:[#allocation4 + $0x2c8] sm:$0xff] }
  0x68   :  { %3191 = vmatprep.subr.bf16.mxu1 %v3383_v3  ;;  %v2995_v3 = vcombine.low %v896_v62, %v904_v63  ;;  %v835_v62 = vld [vmem:[#allocation4 + $0x98] sm:$0xff] }
  0x69   :  { %v843_v63 = vld [vmem:[#allocation4 + $0xd8] sm:$0xff] }
  0x6a   :  { %3170 = vmatpush3.bf16.msra.mxu0 %v3384_v4  ;;  %v2997_v4 = vcombine.low %v897_v0, %v905_v2 }
  0x6b   :  { %3171 = vmatprep.subr.bf16.mxu0 %v3386_v6  ;;  %3192 = vmatpush3.bf16.msra.mxu1 %v3385_v5  ;;  %v2998_v5 = vcombine.high %v897_v0, %v905_v2  ;;  %v912_v6 = vld [vmem:[#allocation4 + $0x300] sm:$0xff] }
  0x6c   :  { %3193 = vmatprep.subr.bf16.mxu1 %v3387_v7  ;;  %v920_v7 = vld [vmem:[#allocation4 + $0x340] sm:$0xff] }
  0x6e   :  { %3172 = vmatpush3.bf16.msra.mxu0 %v3388_v8  ;;  %v913_v8 = vld [vmem:[#allocation4 + $0x308] sm:$0xff] }
  0x6f   :  { %3173 = vmatprep.subr.bf16.mxu0 %v3390_v10  ;;  %3194 = vmatpush3.bf16.msra.mxu1 %v3389_v9  ;;  %v3012_v9 = vcombine.high %v912_v6, %v920_v7  ;;  %v921_v10 = vld [vmem:[#allocation4 + $0x348] sm:$0xff] }
  0x70   :  { %3195 = vmatprep.subr.bf16.mxu1 %v3391_v11  ;;  %v3011_v11 = vcombine.low %v912_v6, %v920_v7  ;;  %v851_v6 = vld [vmem:[#allocation4 + $0x118] sm:$0xff] }
  0x71   :  { %v859_v7 = vld [vmem:[#allocation4 + $0x158] sm:$0xff] }
  0x72   :  { %3174 = vmatpush3.bf16.msra.mxu0 %v3392_v12  ;;  %v3013_v12 = vcombine.low %v913_v8, %v921_v10 }
  0x73   :  { %3175 = vmatprep.subr.bf16.mxu0 %v3394_v14  ;;  %3196 = vmatpush3.bf16.msra.mxu1 %v3393_v13  ;;  %v3014_v13 = vcombine.high %v913_v8, %v921_v10  ;;  %v928_v14 = vld [vmem:[#allocation4 + $0x380] sm:$0xff] }
  0x74   :  { %3197 = vmatprep.subr.bf16.mxu1 %v3395_v15  ;;  %v936_v15 = vld [vmem:[#allocation4 + $0x3c0] sm:$0xff] }
  0x76   :  { %3176 = vmatpush3.bf16.msra.mxu0 %v3396_v16  ;;  %v929_v16 = vld [vmem:[#allocation4 + $0x388] sm:$0xff] }
  0x77   :  { %3198 = vmatpush3.bf16.msra.mxu1 %v3397_v17  ;;  %1584 = vmatprep.subr.bf16.mxu0 %v2916_v24  ;;  %v3028_v17 = vcombine.high %v928_v14, %v936_v15  ;;  %v819_v24 = vld [vmem:[#allocation4 + $0x18] sm:$0xff] }
  0x78   :  { %1625 = vmatprep.subr.bf16.mxu1 %v2918_v29 }
  0x79   :  { %763 = vmatmul.mubr.bf16.vlgmr.msra.gmra.mrb[4].mxu0 %v239_v18  ;;  %v937_v18 = vld [vmem:[#allocation4 + $0x3c8] sm:$0xff] }
  0x7a   :  { %803 = vmatmul.mubr.bf16.vlgmr.msra.gmra.mrb[4].mxu1 %v255_v19  ;;  %1585 = vmatpush1.bf16.msra.mxu0 %v2915_v23  ;;  %v3027_v19 = vcombine.low %v928_v14, %v936_v15  ;;  %v3029_v20 = vcombine.low %v929_v16, %v937_v18  ;;  %v3030_v21 = vcombine.high %v929_v16, %v937_v18  ;;  %v826_v23 = vld [vmem:[#allocation4 + $0x50] sm:$0xff]  ;;  %v867_v14 = vld [vmem:[#allocation4 + $0x198] sm:$0xff] }
  0x7b   :  { %1626 = vmatpush1.bf16.msra.mxu1 %v2917_v28  ;;  %1586 = vmatprep.subr.bf16.mxu0 %v2932_v31  ;;  %v2919_v26 = vcombine.low %v818_v22, %v826_v23  ;;  %v2920_v27 = vcombine.high %v818_v22, %v826_v23  ;;  %v827_v28 = vld [vmem:[#allocation4 + $0x58] sm:$0xff] }
  0x7c   :  { %1627 = vmatprep.subr.bf16.mxu1 %v2934_v36  ;;  %1616 = vmatprep.mubr.bf16.mxu0 %v3566_v25  ;;  %v2921_v29 = vcombine.low %v819_v24, %v827_v28  ;;  %v2922_v31 = vcombine.high %v819_v24, %v827_v28  ;;  %v875_v15 = vld [vmem:[#allocation4 + $0x1d8] sm:$0xff] }
  0x7d   :  { %1657 = vmatprep.mubr.bf16.mxu1 %v3566_v25  ;;  %v883_v22 = vld [vmem:[#allocation4 + $0x218] sm:$0xff] }
  0x7e   :  { %1587 = vmatpush1.bf16.msra.mxu0 %v2931_v40  ;;  %v891_v23 = vld [vmem:[#allocation4 + $0x258] sm:$0xff] }
  0x7f   :  { %1628 = vmatpush1.bf16.msra.mxu1 %v2933_v41  ;;  %1588 = vmatprep.subr.bf16.mxu0 %v2948_v42  ;;  %v2986_v28 = vcombine.high %v883_v22, %v891_v23 }
  0x80   :  { %1629 = vmatprep.subr.bf16.mxu1 %v2950_v43 }
  0x82   :  { %1589 = vmatpush1.bf16.msra.mxu0 %v2947_v48 }
  0x83   :  { %1630 = vmatpush1.bf16.msra.mxu1 %v2949_v49  ;;  %1590 = vmatprep.subr.bf16.mxu0 %v2964_v50 }
  0x84   :  { %1631 = vmatprep.subr.bf16.mxu1 %v2966_v51 }
  0x86   :  { %1591 = vmatpush1.bf16.msra.mxu0 %v2963_v56 }
  0x87   :  { %1632 = vmatpush1.bf16.msra.mxu1 %v2965_v57  ;;  %1592 = vmatprep.subr.bf16.mxu0 %v2980_v58 }
  0x88   :  { %1633 = vmatprep.subr.bf16.mxu1 %v2982_v59 }
  0x8a   :  { %1593 = vmatpush1.bf16.msra.mxu0 %v2979_v60  ;;  %v834_v60 = vld [vmem:[#allocation4 + $0x90] sm:$0xff] }
  0x8b   :  { %1634 = vmatpush1.bf16.msra.mxu1 %v2981_v61  ;;  %1594 = vmatprep.subr.bf16.mxu0 %v2996_v1  ;;  %v842_v61 = vld [vmem:[#allocation4 + $0xd0] sm:$0xff] }
  0x8c   :  { %1635 = vmatprep.subr.bf16.mxu1 %v2998_v5  ;;  %v2936_v2 = vcombine.high %v834_v60, %v842_v61  ;;  %v858_v5 = vld [vmem:[#allocation4 + $0x150] sm:$0xff]  ;;  %v2935_v8 = vcombine.low %v834_v60, %v842_v61 }
  0x8e   :  { %1595 = vmatpush1.bf16.msra.mxu0 %v2995_v3  ;;  %v2938_v3 = vcombine.high %v835_v62, %v843_v63 }
  0x8f   :  { %1636 = vmatpush1.bf16.msra.mxu1 %v2997_v4  ;;  %1596 = vmatprep.subr.bf16.mxu0 %v3012_v9  ;;  %v850_v4 = vld [vmem:[#allocation4 + $0x110] sm:$0xff]  ;;  %v2937_v9 = vcombine.low %v835_v62, %v843_v63  ;;  %v836_v63 = vld [vmem:[#allocation4 + $0xa0] sm:$0xff] }
  0x90   :  { %1637 = vmatprep.subr.bf16.mxu1 %v3014_v13  ;;  %v2952_v10 = vcombine.high %v850_v4, %v858_v5  ;;  %v874_v13 = vld [vmem:[#allocation4 + $0x1d0] sm:$0xff]  ;;  %v2951_v16 = vcombine.low %v850_v4, %v858_v5 }
  0x92   :  { %1597 = vmatpush1.bf16.msra.mxu0 %v3011_v11  ;;  %v2954_v11 = vcombine.high %v851_v6, %v859_v7 }
  0x93   :  { %1638 = vmatpush1.bf16.msra.mxu1 %v3013_v12  ;;  %1598 = vmatprep.subr.bf16.mxu0 %v3028_v17  ;;  %v866_v12 = vld [vmem:[#allocation4 + $0x190] sm:$0xff]  ;;  %v2953_v17 = vcombine.low %v851_v6, %v859_v7 }
  0x94   :  { %1639 = vmatprep.subr.bf16.mxu1 %v3030_v21  ;;  %v2968_v18 = vcombine.high %v866_v12, %v874_v13  ;;  %v890_v21 = vld [vmem:[#allocation4 + $0x250] sm:$0xff]  ;;  %v2967_v24 = vcombine.low %v866_v12, %v874_v13 }
  0x96   :  { %1599 = vmatpush1.bf16.msra.mxu0 %v3027_v19  ;;  %v2970_v19 = vcombine.high %v867_v14, %v875_v15 }
  0x97   :  { %1640 = vmatpush1.bf16.msra.mxu1 %v3029_v20  ;;  %1666 = vmatprep.subr.bf16.mxu0 %v2920_v27  ;;  %v882_v20 = vld [vmem:[#allocation4 + $0x210] sm:$0xff] }
  0x98   :  { %1707 = vmatprep.subr.bf16.mxu1 %v2922_v31  ;;  %v2984_v27 = vcombine.high %v882_v20, %v890_v21  ;;  %v906_v31 = vld [vmem:[#allocation4 + $0x2d0] sm:$0xff] }
 0x12c   :  { %v3133_v32 = vpop.f32.mrb[0].mxu0 }
 0x12d   :  { %v3134_v34 = vpop.f32.mrb[1].mxu0  ;;  %v3155_v36 = vpop.f32.mrb[0].mxu1 }
 0x12e   :  { %v3135_v37 = vadd.f32 %v3134_v34, %v3133_v32  ;;  %v3136_v38 = vpop.f32.mrb[2].mxu0  ;;  %v3156_v39 = vpop.f32.mrb[1].mxu1  ;;  %v899_v32 = vld [vmem:[#allocation4 + $0x298] sm:$0xff]  ;;  %v2983_v34 = vcombine.low %v882_v20, %v890_v21 }
 0x12f   :  { %v3137_v40 = vpop.f32.mrb[3].mxu0  ;;  %v3157_v42 = vadd.f32 %v3156_v39, %v3155_v36  ;;  %v3158_v43 = vpop.f32.mrb[2].mxu1  ;;  %v2985_v36 = vcombine.low %v883_v22, %v891_v23  ;;  %v914_v39 = vld [vmem:[#allocation4 + $0x310] sm:$0xff] }
 0x130   :  { %v685_v41 = vadd.f32 %v3135_v37, %v2850_v33  ;;  %v3159_v44 = vpop.f32.mrb[3].mxu1  ;;  %v907_v33 = vld [vmem:[#allocation4 + $0x2d8] sm:$0xff]  ;;  %v922_v40 = vld [vmem:[#allocation4 + $0x350] sm:$0xff] }
 0x131   :  { %v3002_v38 = vcombine.high %v899_v32, %v907_v33  ;;  %v3001_v44 = vcombine.low %v899_v32, %v907_v33 }
 0x132   :  { %v725_v45 = vadd.f32 %v3157_v42, %v685_v41  ;;  %v915_v41 = vld [vmem:[#allocation4 + $0x318] sm:$0xff] }
 0x133   :  { %v923_v42 = vld [vmem:[#allocation4 + $0x358] sm:$0xff] }
 0x14c   :  { %v3177_v46 = vpop.f32.mrb[4].mxu0 }
 0x14d   :  { %v3178_v47 = vpop.f32.mrb[5].mxu0  ;;  %v3199_v48 = vpop.f32.mrb[4].mxu1 }
 0x14e   :  { %v3179_v49 = vadd.f32 %v3178_v47, %v3177_v46  ;;  %v3180_v50 = vpop.f32.mrb[6].mxu0  ;;  %v3200_v51 = vpop.f32.mrb[5].mxu1  ;;  %v3018_v46 = vcombine.high %v915_v41, %v923_v42  ;;  %v930_v47 = vld [vmem:[#allocation4 + $0x390] sm:$0xff] }
 0x14f   :  { %v3181_v52 = vpop.f32.mrb[7].mxu0  ;;  %v3201_v54 = vadd.f32 %v3200_v51, %v3199_v48  ;;  %v3202_v55 = vpop.f32.mrb[6].mxu1  ;;  %v938_v48 = vld [vmem:[#allocation4 + $0x3d0] sm:$0xff]  ;;  %v939_v50 = vld [vmem:[#allocation4 + $0x3d8] sm:$0xff]  ;;  %v3015_v51 = vcombine.low %v914_v39, %v922_v40 }
 0x150   :  { %v765_v53 = vadd.f32 %v3179_v49, %v725_v45  ;;  %v3203_v56 = vpop.f32.mrb[7].mxu1  ;;  %v3016_v45 = vcombine.high %v914_v39, %v922_v40  ;;  %v931_v49 = vld [vmem:[#allocation4 + $0x398] sm:$0xff]  ;;  %v3017_v52 = vcombine.low %v915_v41, %v923_v42  ;;  %v820_v55 = vld [vmem:[#allocation4 + $0x20] sm:$0xff] }
 0x151   :  { %v828_v56 = vld [vmem:[#allocation4 + $0x60] sm:$0xff]  ;;  %v3033_v60 = vcombine.low %v931_v49, %v939_v50 }
 0x152   :  { %v805_v57 = vadd.f32 %v3201_v54, %v765_v53  ;;  %v3032_v53 = vcombine.high %v930_v47, %v938_v48  ;;  %v3034_v54 = vcombine.high %v931_v49, %v939_v50  ;;  %v2924_v61 = vcombine.high %v820_v55, %v828_v56 }
 0x153   :  { %v2923_v4 = vcombine.low %v820_v55, %v828_v56 }
 0x154   :  { %v810_v58 = vmax.f32 %v805_v57, 0.0  ;;  %v821_v57 = vld [vmem:[#allocation4 + $0x28] sm:$0xff] }
 0x156   :  { %v812_v59 = vrot.slane %v810_v58, 1 }
 0x158   :  { %v814_v0 = vadd.f32 %v812_v59, %v810_v58  ;;  %v829_v58 = vld [vmem:[#allocation4 + $0x68] sm:$0xff]  ;;  %v3031_v59 = vcombine.low %v930_v47, %v938_v48 }
 0x159   :  { %v2926_v62 = vcombine.high %v821_v57, %v829_v58  ;;  %v2925_v5 = vcombine.low %v821_v57, %v829_v58 }
 0x15a   :  { %v3872_v1 = vpack.c.bf16 %v814_v0, %v814_v0  ;;  %v844_v0 = vld [vmem:[#allocation4 + $0xe0] sm:$0xff] }
 0x15b   :  { %v2940_v6 = vcombine.high %v836_v63, %v844_v0  ;;  %v2939_v12 = vcombine.low %v836_v63, %v844_v0 }
 0x15c   :  { %1617 = vmatmul.mubr.bf16.vlgmr.msra.gmra.mrb[8].mxu0 %v3872_v1  ;;  %1658 = vmatmul.mubr.bf16.vlgmr.msra.gmra.mrb[8].mxu1 %v3872_v1 }
 0x15d   :  { %1667 = vmatpush1.bf16.msra.mxu0 %v2919_v26  ;;  %1708 = vmatpush1.bf16.msra.mxu1 %v2921_v29  ;;  %v2969_v26 = vcombine.low %v867_v14, %v875_v15  ;;  %v898_v29 = vld [vmem:[#allocation4 + $0x290] sm:$0xff] }
 0x15e   :  { %1668 = vmatprep.subr.bf16.mxu0 %v2936_v2  ;;  %1709 = vmatprep.subr.bf16.mxu1 %v2938_v3  ;;  %v3000_v37 = vcombine.high %v898_v29, %v906_v31  ;;  %v2999_v43 = vcombine.low %v898_v29, %v906_v31  ;;  %v837_v2 = vld [vmem:[#allocation4 + $0xa8] sm:$0xff] }
 0x15f   :  { %1698 = vmatprep.mubr.bf16.mxu0 %v3566_v25  ;;  %1739 = vmatprep.mubr.bf16.mxu1 %v3566_v25  ;;  %v845_v3 = vld [vmem:[#allocation4 + $0xe8] sm:$0xff] }
 0x160   :  { %v2942_v7 = vcombine.high %v837_v2, %v845_v3  ;;  %v2941_v13 = vcombine.low %v837_v2, %v845_v3 }
 0x161   :  { %1669 = vmatpush1.bf16.msra.mxu0 %v2935_v8  ;;  %1710 = vmatpush1.bf16.msra.mxu1 %v2937_v9  ;;  %v852_v8 = vld [vmem:[#allocation4 + $0x120] sm:$0xff] }
 0x162   :  { %1670 = vmatprep.subr.bf16.mxu0 %v2952_v10  ;;  %1711 = vmatprep.subr.bf16.mxu1 %v2954_v11  ;;  %v860_v9 = vld [vmem:[#allocation4 + $0x160] sm:$0xff]  ;;  %v853_v10 = vld [vmem:[#allocation4 + $0x128] sm:$0xff] }
 0x163   :  { %v861_v11 = vld [vmem:[#allocation4 + $0x168] sm:$0xff]  ;;  %v2956_v14 = vcombine.high %v852_v8, %v860_v9  ;;  %v2955_v20 = vcombine.low %v852_v8, %v860_v9 }
 0x164   :  { %v2958_v15 = vcombine.high %v853_v10, %v861_v11  ;;  %v2957_v21 = vcombine.low %v853_v10, %v861_v11 }
 0x165   :  { %1671 = vmatpush1.bf16.msra.mxu0 %v2951_v16  ;;  %1712 = vmatpush1.bf16.msra.mxu1 %v2953_v17  ;;  %v868_v16 = vld [vmem:[#allocation4 + $0x1a0] sm:$0xff] }
 0x166   :  { %1672 = vmatprep.subr.bf16.mxu0 %v2968_v18  ;;  %1713 = vmatprep.subr.bf16.mxu1 %v2970_v19  ;;  %v876_v17 = vld [vmem:[#allocation4 + $0x1e0] sm:$0xff]  ;;  %v869_v18 = vld [vmem:[#allocation4 + $0x1a8] sm:$0xff] }
 0x167   :  { %v877_v19 = vld [vmem:[#allocation4 + $0x1e8] sm:$0xff]  ;;  %v2972_v22 = vcombine.high %v868_v16, %v876_v17  ;;  %v2971_v29 = vcombine.low %v868_v16, %v876_v17 }
 0x168   :  { %v2974_v23 = vcombine.high %v869_v18, %v877_v19  ;;  %v2973_v31 = vcombine.low %v869_v18, %v877_v19 }
 0x169   :  { %1673 = vmatpush1.bf16.msra.mxu0 %v2967_v24  ;;  %1714 = vmatpush1.bf16.msra.mxu1 %v2969_v26  ;;  %v884_v24 = vld [vmem:[#allocation4 + $0x220] sm:$0xff] }
 0x16a   :  { %1674 = vmatprep.subr.bf16.mxu0 %v2984_v27  ;;  %1715 = vmatprep.subr.bf16.mxu1 %v2986_v28  ;;  %v892_v26 = vld [vmem:[#allocation4 + $0x260] sm:$0xff]  ;;  %v885_v27 = vld [vmem:[#allocation4 + $0x228] sm:$0xff] }
 0x16b   :  { %v893_v28 = vld [vmem:[#allocation4 + $0x268] sm:$0xff]  ;;  %v2988_v32 = vcombine.high %v884_v24, %v892_v26  ;;  %v2987_v39 = vcombine.low %v884_v24, %v892_v26 }
 0x16c   :  { %v2990_v33 = vcombine.high %v885_v27, %v893_v28  ;;  %v2989_v40 = vcombine.low %v885_v27, %v893_v28 }
 0x16d   :  { %1675 = vmatpush1.bf16.msra.mxu0 %v2983_v34  ;;  %1716 = vmatpush1.bf16.msra.mxu1 %v2985_v36  ;;  %v900_v34 = vld [vmem:[#allocation4 + $0x2a0] sm:$0xff] }
 0x16e   :  { %1676 = vmatprep.subr.bf16.mxu0 %v3000_v37  ;;  %1717 = vmatprep.subr.bf16.mxu1 %v3002_v38  ;;  %v908_v36 = vld [vmem:[#allocation4 + $0x2e0] sm:$0xff]  ;;  %v901_v37 = vld [vmem:[#allocation4 + $0x2a8] sm:$0xff] }
 0x16f   :  { %v909_v38 = vld [vmem:[#allocation4 + $0x2e8] sm:$0xff]  ;;  %v3004_v41 = vcombine.high %v900_v34, %v908_v36  ;;  %v3003_v47 = vcombine.low %v900_v34, %v908_v36 }
 0x170   :  { %v3006_v42 = vcombine.high %v901_v37, %v909_v38  ;;  %v3005_v48 = vcombine.low %v901_v37, %v909_v38  ;;  %v902_v38 = vld [vmem:[#allocation4 + $0x2b0] sm:$0xff] }
 0x171   :  { %1677 = vmatpush1.bf16.msra.mxu0 %v2999_v43  ;;  %1718 = vmatpush1.bf16.msra.mxu1 %v3001_v44  ;;  %v916_v43 = vld [vmem:[#allocation4 + $0x320] sm:$0xff] }
 0x172   :  { %1678 = vmatprep.subr.bf16.mxu0 %v3016_v45  ;;  %1719 = vmatprep.subr.bf16.mxu1 %v3018_v46  ;;  %v924_v44 = vld [vmem:[#allocation4 + $0x360] sm:$0xff]  ;;  %v917_v45 = vld [vmem:[#allocation4 + $0x328] sm:$0xff] }
 0x173   :  { %v925_v46 = vld [vmem:[#allocation4 + $0x368] sm:$0xff]  ;;  %v3020_v49 = vcombine.high %v916_v43, %v924_v44  ;;  %v3019_v55 = vcombine.low %v916_v43, %v924_v44 }
 0x174   :  { %v3022_v50 = vcombine.high %v917_v45, %v925_v46  ;;  %v3021_v56 = vcombine.low %v917_v45, %v925_v46  ;;  %v918_v46 = vld [vmem:[#allocation4 + $0x330] sm:$0xff] }
 0x175   :  { %1679 = vmatpush1.bf16.msra.mxu0 %v3015_v51  ;;  %1720 = vmatpush1.bf16.msra.mxu1 %v3017_v52  ;;  %v932_v51 = vld [vmem:[#allocation4 + $0x3a0] sm:$0xff] }
 0x176   :  { %1680 = vmatprep.subr.bf16.mxu0 %v3032_v53  ;;  %1721 = vmatprep.subr.bf16.mxu1 %v3034_v54  ;;  %v940_v52 = vld [vmem:[#allocation4 + $0x3e0] sm:$0xff]  ;;  %v933_v53 = vld [vmem:[#allocation4 + $0x3a8] sm:$0xff] }
 0x177   :  { %v941_v54 = vld [vmem:[#allocation4 + $0x3e8] sm:$0xff]  ;;  %v3036_v57 = vcombine.high %v932_v51, %v940_v52  ;;  %v3035_v63 = vcombine.low %v932_v51, %v940_v52 }
 0x178   :  { %v3038_v58 = vcombine.high %v933_v53, %v941_v54  ;;  %v3037_v0 = vcombine.low %v933_v53, %v941_v54  ;;  %v934_v54 = vld [vmem:[#allocation4 + $0x3b0] sm:$0xff] }
 0x179   :  { %1681 = vmatpush1.bf16.msra.mxu0 %v3031_v59  ;;  %1722 = vmatpush1.bf16.msra.mxu1 %v3033_v60  ;;  %v822_v59 = vld [vmem:[#allocation4 + $0x30] sm:$0xff] }
 0x17a   :  { %1748 = vmatprep.subr.bf16.mxu0 %v2924_v61  ;;  %1789 = vmatprep.subr.bf16.mxu1 %v2926_v62  ;;  %v830_v60 = vld [vmem:[#allocation4 + $0x70] sm:$0xff]  ;;  %v823_v61 = vld [vmem:[#allocation4 + $0x38] sm:$0xff] }
 0x17b   :  { %v831_v62 = vld [vmem:[#allocation4 + $0x78] sm:$0xff]  ;;  %v2928_v2 = vcombine.high %v822_v59, %v830_v60  ;;  %v2927_v8 = vcombine.low %v822_v59, %v830_v60 }
 0x17c   :  { %1699 = vmatmul.mubr.bf16.vlgmr.msra.gmra.mrb[12].mxu0 %v3872_v1  ;;  %1740 = vmatmul.mubr.bf16.vlgmr.msra.gmra.mrb[12].mxu1 %v3872_v1  ;;  %v2930_v3 = vcombine.high %v823_v61, %v831_v62  ;;  %v2929_v9 = vcombine.low %v823_v61, %v831_v62 }
 0x17d   :  { %1749 = vmatpush1.bf16.msra.mxu0 %v2923_v4  ;;  %1790 = vmatpush1.bf16.msra.mxu1 %v2925_v5  ;;  %v838_v4 = vld [vmem:[#allocation4 + $0xb0] sm:$0xff] }
 0x17e   :  { %1750 = vmatprep.subr.bf16.mxu0 %v2940_v6  ;;  %1791 = vmatprep.subr.bf16.mxu1 %v2942_v7  ;;  %v846_v5 = vld [vmem:[#allocation4 + $0xf0] sm:$0xff]  ;;  %v839_v6 = vld [vmem:[#allocation4 + $0xb8] sm:$0xff] }
 0x17f   :  { %1780 = vmatprep.mubr.bf16.mxu0 %v3566_v25  ;;  %1821 = vmatprep.mubr.bf16.mxu1 %v3566_v25  ;;  %v847_v7 = vld [vmem:[#allocation4 + $0xf8] sm:$0xff]  ;;  %v2944_v10 = vcombine.high %v838_v4, %v846_v5  ;;  %v2943_v16 = vcombine.low %v838_v4, %v846_v5  ;;  %v3400_v4 = vld [vmem:[%s3967_s6 + $0x10] sm:$0xff]  }
 0x180   :  { %v2946_v11 = vcombine.high %v839_v6, %v847_v7  ;;  %v2945_v17 = vcombine.low %v839_v6, %v847_v7  ;;  %v3401_v5 = vld [vmem:[%s3967_s6 + $0x18] sm:$0xff]   ;;  %v3407_v6 = vld [vmem:[#allocation6 + $0x40] sm:$0xff]  }
 0x181   :  { %1751 = vmatpush1.bf16.msra.mxu0 %v2939_v12  ;;  %1792 = vmatpush1.bf16.msra.mxu1 %v2941_v13  ;;  %v854_v12 = vld [vmem:[#allocation4 + $0x130] sm:$0xff]  ;;  %v3409_v7 = vld [vmem:[#allocation6] sm:$0xff]  }
 0x182   :  { %1752 = vmatprep.subr.bf16.mxu0 %v2956_v14  ;;  %1793 = vmatprep.subr.bf16.mxu1 %v2958_v15  ;;  %v862_v13 = vld [vmem:[#allocation4 + $0x170] sm:$0xff]  ;;  %v855_v14 = vld [vmem:[#allocation4 + $0x138] sm:$0xff] }
 0x183   :  { %v863_v15 = vld [vmem:[#allocation4 + $0x178] sm:$0xff]  ;;  %v2960_v18 = vcombine.high %v854_v12, %v862_v13  ;;  %v2959_v24 = vcombine.low %v854_v12, %v862_v13  ;;  %v3404_v12 = vld [vmem:[%s3967_s6 + $0x30] sm:$0xff]  }
 0x184   :  { %v2962_v19 = vcombine.high %v855_v14, %v863_v15  ;;  %v2961_v26 = vcombine.low %v855_v14, %v863_v15  ;;  %v3417_v13 = vld [vmem:[#allocation6 + $0x10] sm:$0xff]   ;;  %v3408_v15 = vld [vmem:[#allocation6 + $0xc0] sm:$0xff]  }
 0x185   :  { %1753 = vmatpush1.bf16.msra.mxu0 %v2955_v20  ;;  %1794 = vmatpush1.bf16.msra.mxu1 %v2957_v21  ;;  %v870_v20 = vld [vmem:[#allocation4 + $0x1b0] sm:$0xff] }
 0x186   :  { %1754 = vmatprep.subr.bf16.mxu0 %v2972_v22  ;;  %1795 = vmatprep.subr.bf16.mxu1 %v2974_v23  ;;  %v878_v21 = vld [vmem:[#allocation4 + $0x1f0] sm:$0xff]  ;;  %v871_v22 = vld [vmem:[#allocation4 + $0x1b8] sm:$0xff] }
 0x187   :  { %v879_v23 = vld [vmem:[#allocation4 + $0x1f8] sm:$0xff]  ;;  %v2976_v27 = vcombine.high %v870_v20, %v878_v21  ;;  %v2975_v34 = vcombine.low %v870_v20, %v878_v21  ;;  %v3416_v20 = vld [vmem:[#allocation6 + $0xd0] sm:$0xff]  }
 0x188   :  { %v2978_v28 = vcombine.high %v871_v22, %v879_v23  ;;  %v2977_v36 = vcombine.low %v871_v22, %v879_v23  ;;  %v3405_v14 = vld [vmem:[%s3967_s6 + $0x38] sm:$0xff]  }
 0x189   :  { %1755 = vmatpush1.bf16.msra.mxu0 %v2971_v29  ;;  %1796 = vmatpush1.bf16.msra.mxu1 %v2973_v31  ;;  %v886_v29 = vld [vmem:[#allocation4 + $0x230] sm:$0xff]  ;;  %v3420_v22 = vld [vmem:[#allocation6 + $0x58] sm:$0xff]  }
 0x18a   :  { %1756 = vmatprep.subr.bf16.mxu0 %v2988_v32  ;;  %1797 = vmatprep.subr.bf16.mxu1 %v2990_v33  ;;  %v894_v31 = vld [vmem:[#allocation4 + $0x270] sm:$0xff]  ;;  %v887_v32 = vld [vmem:[#allocation4 + $0x238] sm:$0xff] }
 0x18b   :  { %v895_v33 = vld [vmem:[#allocation4 + $0x278] sm:$0xff]  ;;  %v2992_v37 = vcombine.high %v886_v29, %v894_v31  ;;  %v3418_v21 = vld [vmem:[#allocation6 + $0x90] sm:$0xff]  }
 0x18c   :  { %v2993_v43 = vcombine.low %v887_v32, %v895_v33  ;;  %v3421_v23 = vld [vmem:[#allocation6 + $0xd8] sm:$0xff]  }
 0x18d   :  { %1757 = vmatpush1.bf16.msra.mxu0 %v2987_v39  ;;  %1798 = vmatpush1.bf16.msra.mxu1 %v2989_v40  ;;  %v910_v39 = vld [vmem:[#allocation4 + $0x2f0] sm:$0xff]  ;;  %v903_v40 = vld [vmem:[#allocation4 + $0x2b8] sm:$0xff] }
 0x18e   :  { %1758 = vmatprep.subr.bf16.mxu0 %v3004_v41  ;;  %1799 = vmatprep.subr.bf16.mxu1 %v3006_v42  ;;  %v911_v41 = vld [vmem:[#allocation4 + $0x2f8] sm:$0xff]  ;;  %v2991_v42 = vcombine.low %v886_v29, %v894_v31  ;;  %v3008_v44 = vcombine.high %v902_v38, %v910_v39  ;;  %v3426_v29 = vld [vmem:[#allocation6 + $0x20] sm:$0xff]  }
 0x18f   :  { %v3010_v45 = vcombine.high %v903_v40, %v911_v41  ;;  %v3009_v51 = vcombine.low %v903_v40, %v911_v41  ;;  %v3427_v31 = vld [vmem:[#allocation6 + $0xa0] sm:$0xff]   ;;  %v3436_v40 = vld [vmem:[#allocation6 + $0x78] sm:$0xff]  }
 0x190   :  { %v3437_v41 = vld [vmem:[#allocation6 + $0xf8] sm:$0xff]  }
 0x191   :  { %1759 = vmatpush1.bf16.msra.mxu0 %v3003_v47  ;;  %1800 = vmatpush1.bf16.msra.mxu1 %v3005_v48  ;;  %v926_v47 = vld [vmem:[#allocation4 + $0x370] sm:$0xff]  ;;  %v919_v48 = vld [vmem:[#allocation4 + $0x338] sm:$0xff] }
 0x192   :  { %1760 = vmatprep.subr.bf16.mxu0 %v3020_v49  ;;  %1801 = vmatprep.subr.bf16.mxu1 %v3022_v50  ;;  %v927_v49 = vld [vmem:[#allocation4 + $0x378] sm:$0xff]  ;;  %v3007_v50 = vcombine.low %v902_v38, %v910_v39  ;;  %v3024_v52 = vcombine.high %v918_v46, %v926_v47  ;;  %v3434_v38 = vld [vmem:[#allocation6 + $0x30] sm:$0xff]  }
 0x193   :  { %v3026_v53 = vcombine.high %v919_v48, %v927_v49  ;;  %v3025_v59 = vcombine.low %v919_v48, %v927_v49  ;;  %v3435_v39 = vld [vmem:[#allocation6 + $0xb0] sm:$0xff]  }
 0x195   :  { %1761 = vmatpush1.bf16.msra.mxu0 %v3019_v55  ;;  %1802 = vmatpush1.bf16.msra.mxu1 %v3021_v56  ;;  %v942_v55 = vld [vmem:[#allocation4 + $0x3f0] sm:$0xff]  ;;  %v935_v56 = vld [vmem:[#allocation4 + $0x3b8] sm:$0xff] }
 0x196   :  { %1762 = vmatprep.subr.bf16.mxu0 %v3036_v57  ;;  %1803 = vmatprep.subr.bf16.mxu1 %v3038_v58  ;;  %v943_v57 = vld [vmem:[#allocation4 + $0x3f8] sm:$0xff]  ;;  %v3023_v58 = vcombine.low %v918_v46, %v926_v47  ;;  %v3040_v60 = vcombine.high %v934_v54, %v942_v55  ;;  %v3039_v62 = vcombine.low %v934_v54, %v942_v55 }
 0x197   :  { %v3042_v61 = vcombine.high %v935_v56, %v943_v57 }
 0x199   :  { %1763 = vmatpush1.bf16.msra.mxu0 %v3035_v63  ;;  %1804 = vmatpush1.bf16.msra.mxu1 %v3037_v0  ;;  %v3041_v63 = vcombine.low %v935_v56, %v943_v57  ;;  %v3398_v0 = vld [vmem:[%s3967_s6] sm:$0xff]  }
 0x19a   :  { %1830 = vmatprep.subr.bf16.mxu0 %v2928_v2  ;;  %1871 = vmatprep.subr.bf16.mxu1 %v2930_v3  ;;  %v3567_v2 = vmov 0.0   ;;  %v3399_v3 = vld [vmem:[%s3967_s6 + $0x8] sm:$0xff]  }
 0x19c   :  { %1781 = vmatmul.mubr.bf16.vlgmr.msra.gmra.mrb[16].mxu0 %v3872_v1  ;;  %1822 = vmatmul.mubr.bf16.vlgmr.msra.gmra.mrb[16].mxu1 %v3872_v1 }
 0x19d   :  { %1831 = vmatpush1.bf16.msra.mxu0 %v2927_v8  ;;  %1872 = vmatpush1.bf16.msra.mxu1 %v2929_v9  ;;  %v3411_v8 = vld [vmem:[#allocation6 + $0x48] sm:$0xff]  }
 0x19e   :  { %1832 = vmatprep.subr.bf16.mxu0 %v2944_v10  ;;  %1873 = vmatprep.subr.bf16.mxu1 %v2946_v11  ;;  %v3403_v9 = vld [vmem:[%s3967_s6 + $0x28] sm:$0xff]   ;;  %v3415_v11 = vld [vmem:[#allocation6 + $0x50] sm:$0xff]  }
 0x19f   :  { %1862 = vmatprep.mubr.bf16.mxu0 %v3566_v25  ;;  %1903 = vmatprep.mubr.bf16.mxu1 %v3566_v25  ;;  %v2994_v25 = vcombine.high %v887_v32, %v895_v33  ;;  %v3413_v10 = vld [vmem:[#allocation6 + $0x8] sm:$0xff]  }
 0x1a0   :  { %v3428_v32 = vld [vmem:[#allocation6 + $0x68] sm:$0xff]  }
 0x1a1   :  { %1833 = vmatpush1.bf16.msra.mxu0 %v2943_v16  ;;  %1874 = vmatpush1.bf16.msra.mxu1 %v2945_v17  ;;  %v3406_v16 = vld [vmem:[%s3966_s5] sm:$0xff]   ;;  %v3429_v33 = vld [vmem:[#allocation6 + $0xe8] sm:$0xff]  }
 0x1a2   :  { %1834 = vmatprep.subr.bf16.mxu0 %v2960_v18  ;;  %1875 = vmatprep.subr.bf16.mxu1 %v2962_v19  ;;  %v3410_v17 = vld [vmem:[#allocation6 + $0x80] sm:$0xff]   ;;  %v3412_v18 = vld [vmem:[#allocation6 + $0xc8] sm:$0xff]  }
 0x1a3   :  { %v3414_v19 = vld [vmem:[#allocation6 + $0x88] sm:$0xff]  }
 0x1a5   :  { %1835 = vmatpush1.bf16.msra.mxu0 %v2959_v24  ;;  %1876 = vmatpush1.bf16.msra.mxu1 %v2961_v26  ;;  %v3422_v24 = vld [vmem:[#allocation6 + $0x18] sm:$0xff]  }
 0x1a6   :  { %1836 = vmatprep.subr.bf16.mxu0 %v2976_v27  ;;  %1877 = vmatprep.subr.bf16.mxu1 %v2978_v28  ;;  %v3423_v26 = vld [vmem:[#allocation6 + $0x98] sm:$0xff]   ;;  %v3424_v27 = vld [vmem:[#allocation6 + $0x60] sm:$0xff]  }
 0x1a7   :  { %v3425_v28 = vld [vmem:[#allocation6 + $0xe0] sm:$0xff]  }
 0x1a9   :  { %1837 = vmatpush1.bf16.msra.mxu0 %v2975_v34  ;;  %1878 = vmatpush1.bf16.msra.mxu1 %v2977_v36  ;;  %v3430_v34 = vld [vmem:[#allocation6 + $0x28] sm:$0xff]  }
 0x1aa   :  { %1838 = vmatprep.subr.bf16.mxu0 %v2992_v37  ;;  %1879 = vmatprep.subr.bf16.mxu1 %v2994_v25  ;;  %v3431_v36 = vld [vmem:[#allocation6 + $0xa8] sm:$0xff]   ;;  %v3432_v37 = vld [vmem:[#allocation6 + $0x70] sm:$0xff]  }
 0x1ab   :  { %v3433_v25 = vld [vmem:[#allocation6 + $0xf0] sm:$0xff]  }
 0x1ad   :  { %1839 = vmatpush1.bf16.msra.mxu0 %v2991_v42  ;;  %1880 = vmatpush1.bf16.msra.mxu1 %v2993_v43  ;;  %v3438_v42 = vld [vmem:[#allocation6 + $0x38] sm:$0xff]  }
 0x1ae   :  { %1840 = vmatprep.subr.bf16.mxu0 %v3008_v44  ;;  %1881 = vmatprep.subr.bf16.mxu1 %v3010_v45  ;;  %v3439_v43 = vld [vmem:[#allocation6 + $0xb8] sm:$0xff]   ;;  %v3440_v44 = vld [vmem:[#allocation6 + $0x140] sm:$0xff]  }
 0x1af   :  { %v3441_v45 = vld [vmem:[#allocation6 + $0x1c0] sm:$0xff]  }
 0x1b1   :  { %1841 = vmatpush1.bf16.msra.mxu0 %v3007_v50  ;;  %1882 = vmatpush1.bf16.msra.mxu1 %v3009_v51 }
 0x1b2   :  { %1842 = vmatprep.subr.bf16.mxu0 %v3024_v52  ;;  %1883 = vmatprep.subr.bf16.mxu1 %v3026_v53 }
 0x1b5   :  { %1843 = vmatpush1.bf16.msra.mxu0 %v3023_v58  ;;  %1884 = vmatpush1.bf16.msra.mxu1 %v3025_v59 }
 0x1b6   :  { %1844 = vmatprep.subr.bf16.mxu0 %v3040_v60  ;;  %1885 = vmatprep.subr.bf16.mxu1 %v3042_v61 }
 0x1b9   :  { %1845 = vmatpush1.bf16.msra.mxu0 %v3039_v62  ;;  %1886 = vmatpush1.bf16.msra.mxu1 %v3041_v63  ;;  %v3569_v62 = vmov 1983009808  }
 0x1ba   :  { %3302 = vmatprep.subr.bf16.mxu0 %v3567_v2  ;;  %3214 = vmatprep.subr.bf16.mxu1 %v3407_v6  ;;  %v1951_v63 = vunpack.c.l.s4 %v3569_v62 }
 0x1bc   :  { %1863 = vmatmul.mubr.bf16.vlgmr.msra.gmra.mrb[20].mxu0 %v3872_v1  ;;  %1904 = vmatmul.mubr.bf16.vlgmr.msra.gmra.mrb[20].mxu1 %v3872_v1  ;;  %v3402_v1 = vld [vmem:[%s3967_s6 + $0x20] sm:$0xff]  }
 0x1bd   :  { %3303 = vmatpush3.bf16.msra.mxu0 %v3398_v0  ;;  %3318 = vmatprep.mubr.msk.bf16.mxu0 %vm3568_vm0, %v3567_v2  ;;  %v1952_v0 = vunpack.c.0.s8 %v1951_v63 }
 0x1be   :  { %3304 = vmatprep.subr.bf16.mxu0 %v3567_v2  ;;  %3215 = vmatpush3.bf16.msra.mxu1 %v3409_v7 }
 0x1bf   :  { %3216 = vmatprep.subr.bf16.mxu1 %v3411_v8 }
 0x1c1   :  { %3305 = vmatpush3.bf16.msra.mxu0 %v3399_v3  ;;  %v3927_v3 = vsub.s32 %v1952_v0, %v3737_v30 }
 0x1c2   :  { %3306 = vmatprep.subr.bf16.mxu0 %v3567_v2  ;;  %3217 = vmatpush3.bf16.msra.mxu1 %v3413_v10 }
 0x1c3   :  { %3218 = vmatprep.subr.bf16.mxu1 %v3415_v11 }
 0x1c5   :  { %3307 = vmatpush3.bf16.msra.mxu0 %v3400_v4 }
 0x1c6   :  { %3308 = vmatprep.subr.bf16.mxu0 %v3567_v2  ;;  %3219 = vmatpush3.bf16.msra.mxu1 %v3417_v13 }
 0x1c7   :  { %3220 = vmatprep.subr.bf16.mxu1 %v3420_v22 }
 0x1c9   :  { %3309 = vmatpush3.bf16.msra.mxu0 %v3401_v5 }
 0x1ca   :  { %3310 = vmatprep.subr.bf16.mxu0 %v3567_v2  ;;  %3221 = vmatpush3.bf16.msra.mxu1 %v3422_v24 }
 0x1cb   :  { %3222 = vmatprep.subr.bf16.mxu1 %v3424_v27 }
 0x1cd   :  { %3311 = vmatpush3.bf16.msra.mxu0 %v3402_v1 }
 0x1ce   :  { %3312 = vmatprep.subr.bf16.mxu0 %v3567_v2  ;;  %3223 = vmatpush3.bf16.msra.mxu1 %v3426_v29 }
 0x1cf   :  { %3224 = vmatprep.subr.bf16.mxu1 %v3428_v32 }
 0x1d1   :  { %3313 = vmatpush3.bf16.msra.mxu0 %v3403_v9 }
 0x1d2   :  { %3314 = vmatprep.subr.bf16.mxu0 %v3567_v2  ;;  %3225 = vmatpush3.bf16.msra.mxu1 %v3430_v34 }
 0x1d3   :  { %3226 = vmatprep.subr.bf16.mxu1 %v3432_v37 }
 0x1d5   :  { %3315 = vmatpush3.bf16.msra.mxu0 %v3404_v12 }
 0x1d6   :  { %3316 = vmatprep.subr.bf16.mxu0 %v3567_v2  ;;  %3227 = vmatpush3.bf16.msra.mxu1 %v3434_v38  ;;  %v1945_v2 = vld [vmem:[%s3965_s4] sm:$0xff] }
 0x1d7   :  { %3228 = vmatprep.subr.bf16.mxu1 %v3436_v40  ;;  %v1949_v4 = vcombine.high %v1945_v2, %v1945_v2  ;;  %v1956_v5 = vrot.slane %v1945_v2, %v3927_v3  ;;  %v3443_v38 = vld [vmem:[#allocation6 + $0x180] sm:$0xff]  }
 0x1d9   :  { %3317 = vmatpush3.bf16.msra.mxu0 %v3405_v14  ;;  %v1963_v1 = vrot.slane %v1949_v4, %v3927_v3  ;;  %v1964_v11 = vcombine.high %v1956_v5, %v1956_v5 }
 0x1da   :  { %3236 = vmatprep.subr.bf16.mxu0 %v3408_v15  ;;  %3229 = vmatpush3.bf16.msra.mxu1 %v3438_v42  ;;  %v1946_v42 = vld [vmem:[%s3965_s4 + $0x8] sm:$0xff] }
 0x1db   :  { %3258 = vmatprep.subr.bf16.mxu1 %v3440_v44  ;;  %v1965_v13 = vcombine.high %v1963_v1, %v1963_v1  ;;  %v3447_v44 = vld [vmem:[#allocation6 + $0x188] sm:$0xff]  }
 0x1dc   :  { %3319 = vmatmul.mubr.bf16.vlgmr.msra.gmra.mrb[24].mxu0 %v3406_v16 }
 0x1dd   :  { %3237 = vmatpush3.bf16.msra.mxu0 %v3410_v17 }
 0x1de   :  { %3238 = vmatprep.subr.bf16.mxu0 %v3412_v18 }
 0x1e1   :  { %3239 = vmatpush3.bf16.msra.mxu0 %v3414_v19 }
 0x1e2   :  { %3240 = vmatprep.subr.bf16.mxu0 %v3416_v20 }
 0x1e5   :  { %3241 = vmatpush3.bf16.msra.mxu0 %v3418_v21 }
 0x1e6   :  { %3242 = vmatprep.subr.bf16.mxu0 %v3421_v23 }
 0x1e9   :  { %3243 = vmatpush3.bf16.msra.mxu0 %v3423_v26 }
 0x1ea   :  { %3244 = vmatprep.subr.bf16.mxu0 %v3425_v28 }
 0x1ed   :  { %3245 = vmatpush3.bf16.msra.mxu0 %v3427_v31 }
 0x1ee   :  { %3246 = vmatprep.subr.bf16.mxu0 %v3429_v33 }
 0x1f1   :  { %3247 = vmatpush3.bf16.msra.mxu0 %v3431_v36  ;;  %v3442_v36 = vld [vmem:[#allocation6 + $0x100] sm:$0xff]  }
 0x1f2   :  { %3248 = vmatprep.subr.bf16.mxu0 %v3433_v25 }
 0x1f5   :  { %3249 = vmatpush3.bf16.msra.mxu0 %v3435_v39  ;;  %v3444_v39 = vld [vmem:[#allocation6 + $0x148] sm:$0xff]  }
 0x1f6   :  { %3250 = vmatprep.subr.bf16.mxu0 %v3437_v41  ;;  %v3445_v41 = vld [vmem:[#allocation6 + $0x1c8] sm:$0xff]  }
 0x1f9   :  { %3251 = vmatpush3.bf16.msra.mxu0 %v3439_v43  ;;  %v3446_v43 = vld [vmem:[#allocation6 + $0x108] sm:$0xff]  }
 0x1fa   :  { %3280 = vmatprep.subr.bf16.mxu0 %v3441_v45  ;;  %v3448_v45 = vld [vmem:[#allocation6 + $0x150] sm:$0xff]  }
 0x22f   :  { %v1618_v46 = vpop.f32.mrb[8].mxu0  ;;  %v1659_v47 = vpop.f32.mrb[8].mxu1 }
 0x230   :  { %v1620_v48 = vpop.f32.mrb[9].mxu0  ;;  %v1661_v49 = vpop.f32.mrb[9].mxu1 }
 0x231   :  { %v1622_v50 = vpop.f32.mrb[10].mxu0  ;;  %v1663_v51 = vpop.f32.mrb[10].mxu1 }
 0x232   :  { %v1623_v52 = vpop.f32.mrb[11].mxu0  ;;  %v1664_v53 = vpop.f32.mrb[11].mxu1  ;;  %v3453_v50 = vld [vmem:[#allocation6 + $0x158] sm:$0xff]   ;;  %v1973_v51 = vrot.slane %v1946_v42, %v3927_v3 }
 0x233   :  { %v3454_v53 = vld [vmem:[#allocation6 + $0x1d8] sm:$0xff]  }
 0x234   :  { %v1981_v2 = vcombine.high %v1973_v51, %v1973_v51 }
 0x24f   :  { %v3915_v54 = vpop.f32.mrb[12].mxu0  ;;  %v3917_v55 = vpop.f32.mrb[12].mxu1 }
 0x250   :  { %v3919_v56 = vpop.f32.mrb[13].mxu0  ;;  %v3921_v57 = vpop.f32.mrb[13].mxu1 }
 0x251   :  { %v1704_v58 = vpop.f32.mrb[14].mxu0  ;;  %v1745_v59 = vpop.f32.mrb[14].mxu1 }
 0x252   :  { %v1705_v60 = vpop.f32.mrb[15].mxu0  ;;  %v1746_v61 = vpop.f32.mrb[15].mxu1  ;;  %v3455_v58 = vld [vmem:[#allocation6 + $0x118] sm:$0xff]  }
 0x253   :  { %v3456_v61 = vld [vmem:[#allocation6 + $0x198] sm:$0xff]  }
 0x26f   :  { %v1782_v6 = vpop.f32.mrb[16].mxu0  ;;  %v1823_v7 = vpop.f32.mrb[16].mxu1 }
 0x270   :  { %v1920_v8 = vrot.slane %v1782_v6, 7  ;;  %v1922_v9 = vrot.slane %v1823_v7, 7  ;;  %v1784_v10 = vpop.f32.mrb[17].mxu0  ;;  %v1825_v12 = vpop.f32.mrb[17].mxu1  ;;  %v3458_v6 = vld [vmem:[#allocation6 + $0x1e0] sm:$0xff]  }
 0x271   :  { %v1921_v14 = vrot.slane %v1784_v10, 7  ;;  %v1923_v15 = vrot.slane %v1825_v12, 7  ;;  %v1786_v16 = vpop.f32.mrb[18].mxu0  ;;  %v1827_v17 = vpop.f32.mrb[18].mxu1 }
 0x272   :  { %v1937_v18 = vsel %vm1936_vm1, %v1618_v46, %v1920_v8  ;;  %v1939_v19 = vsel %vm1936_vm1, %v1659_v47, %v1922_v9  ;;  %v1787_v20 = vpop.f32.mrb[19].mxu0  ;;  %v1828_v21 = vpop.f32.mrb[19].mxu1  ;;  %v3449_v46 = vld [vmem:[#allocation6 + $0x1d0] sm:$0xff]   ;;  %v1966_v47 = vcombine.high %v1946_v42, %v1946_v42 }
 0x273   :  { %v1991_v22 = vadd.f32 %v1956_v5, %v1937_v18  ;;  %v1993_v23 = vadd.f32 %v1963_v1, %v1939_v19  ;;  %v1938_v24 = vsel %vm1936_vm1, %v1620_v48, %v1921_v14  ;;  %v1940_v26 = vsel %vm1936_vm1, %v1661_v49, %v1923_v15  ;;  %v3450_v48 = vld [vmem:[#allocation6 + $0x110] sm:$0xff]   ;;  %v3457_v1 = vld [vmem:[#allocation6 + $0x160] sm:$0xff]   ;;  %v3461_v20 = vld [vmem:[#allocation6 + $0x168] sm:$0xff]  }
 0x274   :  { %v1992_v27 = vadd.f32 %v1964_v11, %v1938_v24  ;;  %v1994_v28 = vadd.f32 %v1965_v13, %v1940_v26  ;;  %v3451_v49 = vld [vmem:[#allocation6 + $0x190] sm:$0xff]   ;;  %v1980_v52 = vrot.slane %v1966_v47, %v3927_v3  ;;  %v3459_v14 = vld [vmem:[#allocation6 + $0x120] sm:$0xff]  }
 0x275   :  { %3473 = vtanh.f32 %v1991_v22  ;;  %v3460_v19 = vld [vmem:[#allocation6 + $0x1a0] sm:$0xff]   ;;  %v3463_v22 = vld [vmem:[#allocation6 + $0x128] sm:$0xff]   ;;  %v3467_v24 = vld [vmem:[#allocation6 + $0x130] sm:$0xff]  }
 0x276   :  { %3475 = vtanh.f32 %v1993_v23  ;;  %v1982_v5 = vcombine.high %v1980_v52, %v1980_v52  ;;  %v3464_v23 = vld [vmem:[#allocation6 + $0x1a8] sm:$0xff]   ;;  %v3468_v26 = vld [vmem:[#allocation6 + $0x1b0] sm:$0xff]  }
 0x277   :  { %3477 = vtanh.f32 %v1992_v27  ;;  %v3469_v27 = vld [vmem:[#allocation6 + $0x178] sm:$0xff]  }
 0x278   :  { %3479 = vtanh.f32 %v1994_v28  ;;  %v3470_v28 = vld [vmem:[#allocation6 + $0x1f8] sm:$0xff]  }
 0x27f   :  { %v3474_v29 = vpop.eup %3473 }
 0x280   :  { %v3476_v31 = vpop.eup %3475  ;;  %v2120_v25 = vpack.c.bf16 %v3474_v29, %v3474_v29  ;;  %v3471_v29 = vld [vmem:[#allocation6 + $0x138] sm:$0xff]  }
 0x281   :  { %v3478_v32 = vpop.eup %3477  ;;  %v2122_v40 = vpack.c.bf16 %v3476_v31, %v3476_v31 }
 0x282   :  { %v3480_v33 = vpop.eup %3479  ;;  %v2121_v34 = vpack.c.bf16 %v3478_v32, %v3478_v32  ;;  %v3472_v32 = vld [vmem:[#allocation6 + $0x1b8] sm:$0xff]  }
 0x283   :  { %v2123_v37 = vpack.c.bf16 %v3480_v33, %v3480_v33 }
 0x284   :  { %2679 = vmatprep.mubr.bf16.mxu1 %v2121_v34 }
 0x285   :  { %2719 = vmatprep.mubr.bf16.mxu0 %v2123_v37  ;;  %2680 = vmatmul.mubr.bf16.vlgmr.msra.gmra.mrb[24].mxu1 %v2120_v25 }
 0x286   :  { %2720 = vmatmul.mubr.bf16.vlgmr.msra.gmra.mrb[28].mxu0 %v2122_v40  ;;  %3259 = vmatpush3.bf16.msra.mxu1 %v3442_v36 }
 0x287   :  { %3281 = vmatpush3.bf16.msra.mxu0 %v3443_v38  ;;  %3260 = vmatprep.subr.bf16.mxu1 %v3444_v39 }
 0x288   :  { %3282 = vmatprep.subr.bf16.mxu0 %v3445_v41 }
 0x28a   :  { %3261 = vmatpush3.bf16.msra.mxu1 %v3446_v43 }
 0x28b   :  { %3283 = vmatpush3.bf16.msra.mxu0 %v3447_v44  ;;  %3262 = vmatprep.subr.bf16.mxu1 %v3448_v45 }
 0x28c   :  { %3284 = vmatprep.subr.bf16.mxu0 %v3449_v46  ;;  %v3052_v46 = vld [vmem:[%s3969_s8] ss:$0 sm:$0xff] }
 0x28e   :  { %3263 = vmatpush3.bf16.msra.mxu1 %v3450_v48 }
 0x28f   :  { %3285 = vmatpush3.bf16.msra.mxu0 %v3451_v49  ;;  %v1864_v59 = vpop.f32.mrb[20].mxu0  ;;  %v1905_v60 = vpop.f32.mrb[20].mxu1  ;;  %3264 = vmatprep.subr.bf16.mxu1 %v3453_v50 }
 0x290   :  { %v1924_v62 = vrot.slane %v1864_v59, 7  ;;  %v1926_v63 = vrot.slane %v1905_v60, 7  ;;  %v1866_v0 = vpop.f32.mrb[21].mxu0  ;;  %v1907_v4 = vpop.f32.mrb[21].mxu1  ;;  %3286 = vmatprep.subr.bf16.mxu0 %v3454_v53 }
 0x291   :  { %v1925_v7 = vrot.slane %v1866_v0, 7  ;;  %v1927_v8 = vrot.slane %v1907_v4, 7  ;;  %v1868_v3 = vpop.f32.mrb[22].mxu0  ;;  %v1909_v9 = vpop.f32.mrb[22].mxu1 }
 0x292   :  { %v1941_v10 = vsel %vm1936_vm1, %v3915_v54, %v1924_v62  ;;  %v1943_v11 = vsel %vm1936_vm1, %v3917_v55, %v1926_v63  ;;  %3265 = vmatpush3.bf16.msra.mxu1 %v3455_v58  ;;  %v1869_v12 = vpop.f32.mrb[23].mxu0  ;;  %v1910_v13 = vpop.f32.mrb[23].mxu1  ;;  %v3462_v55 = vld [vmem:[#allocation6 + $0x1e8] sm:$0xff]  }
 0x293   :  { %v1995_v15 = vadd.f32 %v1973_v51, %v1941_v10  ;;  %v1997_v16 = vadd.f32 %v1980_v52, %v1943_v11  ;;  %v1942_v17 = vsel %vm1936_vm1, %v3919_v56, %v1925_v7  ;;  %v1944_v18 = vsel %vm1936_vm1, %v3921_v57, %v1927_v8  ;;  %3287 = vmatpush3.bf16.msra.mxu0 %v3456_v61  ;;  %v3465_v56 = vld [vmem:[#allocation6 + $0x170] sm:$0xff]  }
 0x294   :  { %v1996_v21 = vadd.f32 %v1981_v2, %v1942_v17  ;;  %v1998_v54 = vadd.f32 %v1982_v5, %v1944_v18  ;;  %3266 = vmatprep.subr.bf16.mxu1 %v3457_v1  ;;  %3288 = vmatprep.subr.bf16.mxu0 %v3458_v6  ;;  %v3466_v57 = vld [vmem:[#allocation6 + $0x1f0] sm:$0xff]   ;;  %v2832_v10 = vsub.s32 0, %v3737_v30 }
 0x295   :  { %3481 = vtanh.f32 %v1995_v15 }
 0x296   :  { %3483 = vtanh.f32 %v1997_v16  ;;  %3267 = vmatpush3.bf16.msra.mxu1 %v3459_v14 }
 0x297   :  { %3485 = vtanh.f32 %v1996_v21  ;;  %3289 = vmatpush3.bf16.msra.mxu0 %v3460_v19  ;;  %3268 = vmatprep.subr.bf16.mxu1 %v3461_v20 }
 0x298   :  { %3487 = vtanh.f32 %v1998_v54  ;;  %3290 = vmatprep.subr.bf16.mxu0 %v3462_v55 }
 0x29a   :  { %3269 = vmatpush3.bf16.msra.mxu1 %v3463_v22 }
 0x29b   :  { %3291 = vmatpush3.bf16.msra.mxu0 %v3464_v23  ;;  %3270 = vmatprep.subr.bf16.mxu1 %v3465_v56 }
 0x29c   :  { %3292 = vmatprep.subr.bf16.mxu0 %v3466_v57 }
 0x29e   :  { %3271 = vmatpush3.bf16.msra.mxu1 %v3467_v24 }
 0x29f   :  { %v3482_v31 = vpop.eup %3481  ;;  %3293 = vmatpush3.bf16.msra.mxu0 %v3468_v26  ;;  %3272 = vmatprep.subr.bf16.mxu1 %v3469_v27 }
 0x2a0   :  { %v3484_v33 = vpop.eup %3483  ;;  %3294 = vmatprep.subr.bf16.mxu0 %v3470_v28  ;;  %v2124_v38 = vpack.c.bf16 %v3482_v31, %v3482_v31 }
 0x2a1   :  { %v3486_v34 = vpop.eup %3485  ;;  %v2126_v39 = vpack.c.bf16 %v3484_v33, %v3484_v33 }
 0x2a2   :  { %v3488_v36 = vpop.eup %3487  ;;  %3273 = vmatpush3.bf16.msra.mxu1 %v3471_v29  ;;  %v2125_v37 = vpack.c.bf16 %v3486_v34, %v3486_v34 }
 0x2a3   :  { %3295 = vmatpush3.bf16.msra.mxu0 %v3472_v32  ;;  %v2127_v25 = vpack.c.bf16 %v3488_v36, %v3488_v36 }
 0x2a4   :  { %2759 = vmatprep.mubr.bf16.mxu1 %v2125_v37 }
 0x2a5   :  { %2799 = vmatprep.mubr.bf16.mxu0 %v2127_v25  ;;  %2760 = vmatmul.mubr.bf16.vlgmr.msra.gmra.mrb[28].mxu1 %v2124_v38 }
 0x2a6   :  { %2800 = vmatmul.mubr.bf16.vlgmr.msra.gmra.mrb[32].mxu0 %v2126_v39 }
 0x2af   :  { %v2113_v40 = vpop.f32.mrb[24].mxu0 }
 0x2b0   :  { %v3320_v41 = vpop.f32.mrb[25].mxu0 }
 0x2b1   :  { %v2116_v42 = vpop.f32.mrb[26].mxu0 }
 0x2b2   :  { %v3321_v43 = vpop.f32.mrb[27].mxu0 }
 0x358   :  { %v3230_v44 = vpop.f32.mrb[24].mxu1 }
 0x359   :  { %v3252_v45 = vpop.f32.mrb[28].mxu0  ;;  %v3231_v47 = vpop.f32.mrb[25].mxu1 }
 0x35a   :  { %v3232_v48 = vadd.f32 %v3231_v47, %v3230_v44  ;;  %v3253_v49 = vpop.f32.mrb[29].mxu0  ;;  %v3233_v50 = vpop.f32.mrb[26].mxu1 }
 0x35b   :  { %v3254_v51 = vadd.f32 %v3253_v49, %v3252_v45  ;;  %v3255_v52 = vpop.f32.mrb[30].mxu0  ;;  %v3234_v53 = vpop.f32.mrb[27].mxu1 }
 0x35c   :  { %v2682_v58 = vadd.f32 %v3232_v48, %v3052_v46  ;;  %v3256_v59 = vpop.f32.mrb[31].mxu0 }
 0x35e   :  { %v2722_v60 = vadd.f32 %v3254_v51, %v2682_v58 }
 0x378   :  { %v3274_v61 = vpop.f32.mrb[28].mxu1 }
 0x379   :  { %v3296_v62 = vpop.f32.mrb[32].mxu0  ;;  %v3275_v63 = vpop.f32.mrb[29].mxu1 }
 0x37a   :  { %v3276_v0 = vadd.f32 %v3275_v63, %v3274_v61  ;;  %v3297_v2 = vpop.f32.mrb[33].mxu0  ;;  %v3277_v4 = vpop.f32.mrb[30].mxu1 }
 0x37b   :  { %v3298_v5 = vadd.f32 %v3297_v2, %v3296_v62  ;;  %v3299_v1 = vpop.f32.mrb[34].mxu0  ;;  %v3278_v6 = vpop.f32.mrb[31].mxu1 }
 0x37c   :  { %v2762_v7 = vadd.f32 %v3276_v0, %v2722_v60  ;;  %v3300_v8 = vpop.f32.mrb[35].mxu0 }
 0x37e   :  { %v2802_v3 = vadd.f32 %v3298_v5, %v2762_v7 }
 0x380   :  { %v2814_v9 = vrot.slane %v2802_v3, %v3752_v35 }
 0x382   :  { %v2815_v11 = vcombine.high %v2814_v9, %v2814_v9  ;;  %v2822_v12 = vrot.slane %v2814_v9, %v3752_v35 }
 0x384   :  { %v2829_v13 = vrot.slane %v2815_v11, %v3752_v35  ;;  %v2833_v14 = vrot.slane %v2822_v12, %v2832_v10 }
 0x386   :  { %v2837_v15 = vrot.slane %v2829_v13, %v2832_v10  ;;  %v2840_v16 = vadd.f32 %v2833_v14, %v2113_v40 }
 0x388   :  { %v2841_v17 = vadd.f32 %v2837_v15, %v2116_v42  ;;  %2842 = vst [vmem:[%s3970_s9] sm:$0xff] %v2840_v16 }
 0x38a   :  { %2843 = vst [vmem:[%s3970_s9 + $0x8] sm:$0xff] %v2841_v17 }
 0x38b   :  { %2848 = vsyncpa [#allocation3], 1 }
 0x38c   :  { %2849 = vsyncpa [#allocation5], 1 }

</bundles_post_ra>
